<compile_context>
chip_gen: v7x
topology: tpu7x:2x2x1
jax: 0.10.0
libtpu: 0.0.40
codegen_flags: <defaults>
</compile_context>

<pallas_src>
import functools

import jax
import jax.numpy as jnp
from jax.experimental import pallas as pl
from jax.experimental.pallas import tpu as pltpu

BN_EPS = 1e-5
LANE = 128                      # pad channel / contraction dims to vreg lane width
MAX_TM = 256                    # row-tile cap (fits v5e's 16 MiB scoped VMEM easily)
VMEM_LIMIT = 16 * 1024 * 1024   # explicit scoped-VMEM budget (safe on v5e/v6e/v7x)


# ----------------------------- helpers --------------------------------------

def _round_up(x, m):
    return ((x + m - 1) // m) * m


def _pick_tm(m):
    """Largest row tile (<= MAX_TM, multiple of 8) that divides M."""
    for t in (MAX_TM, 128, 64, 32, 16, 8):
        if m % t == 0:
            return t
    return m  # fall back to the full extent (equals full array dim)


def _compiler_params():
    return pltpu.CompilerParams(
        dimension_semantics=("parallel",),
        vmem_limit_bytes=VMEM_LIMIT,
    )


def _pad_cols(x2d, width):
    pad = width - x2d.shape[1]
    return jnp.pad(x2d, ((0, 0), (0, pad))) if pad > 0 else x2d


# ----------------------------- Pallas kernels -------------------------------

def _conv12_stats_kernel(p_ref, w1_ref, b1_ref, w2_ref, b2_ref,
                         y_ref, stm_ref, stc_ref):
    """Fused: conv1 (3x3 via im2col patches) + conv2 (1x1) + biases,
    plus per-tile BatchNorm partial stats (mean, centered sum of squares)."""
    y1 = jnp.dot(p_ref[...], w1_ref[...], preferred_element_type=jnp.float32)
    y1 = y1 + b1_ref[...]
    y2 = jnp.dot(y1.astype(jnp.bfloat16), w2_ref[...],
                 preferred_element_type=jnp.float32)
    y2 = y2 + b2_ref[...]
    y_ref[...] = y2

    tm = y2.shape[0]
    mean = jnp.sum(y2, axis=0, keepdims=True) * (1.0 / tm)       # (1, LANE)
    d = y2 - mean
    css = jnp.sum(d * d, axis=0, keepdims=True)                  # (1, LANE)
    stm_ref[...] = mean.reshape(1, 1, LANE)
    stc_ref[...] = css.reshape(1, 1, LANE)


def _conv_stats_kernel(p_ref, w_ref, b_ref, y_ref, stm_ref, stc_ref):
    """conv3 (3x3 stride 2 via im2col patches) + bias, plus per-tile BN stats."""
    y = jnp.dot(p_ref[...], w_ref[...], preferred_element_type=jnp.float32)
    y = y + b_ref[...]
    y_ref[...] = y

    tm = y.shape[0]
    mean = jnp.sum(y, axis=0, keepdims=True) * (1.0 / tm)
    d = y - mean
    css = jnp.sum(d * d, axis=0, keepdims=True)
    stm_ref[...] = mean.reshape(1, 1, LANE)
    stc_ref[...] = css.reshape(1, 1, LANE)


def _bn_swish_kernel(y_ref, scale_ref, shift_ref, o_ref):
    """BatchNorm phase 2 (per-channel scale/shift already folded) + Swish."""
    z = y_ref[...] * scale_ref[...] + shift_ref[...]
    o_ref[...] = z * jax.nn.sigmoid(z)


# ----------------------------- kernel wrappers ------------------------------

def conv12_fused(patches_bf16, w1, b1, w2, b2):
    m, kdim = patches_bf16.shape
    tm = _pick_tm(m)
    n_tiles = m // tm
    out = pl.pallas_call(
        _conv12_stats_kernel,
        out_shape=(
            jax.ShapeDtypeStruct((m, LANE), jnp.float32),
            jax.ShapeDtypeStruct((n_tiles, 1, LANE), jnp.float32),
            jax.ShapeDtypeStruct((n_tiles, 1, LANE), jnp.float32),
        ),
        grid=(n_tiles,),
        in_specs=[
            pl.BlockSpec((tm, kdim), lambda i: (i, 0)),
            pl.BlockSpec((kdim, LANE), lambda i: (0, 0)),
            pl.BlockSpec((1, LANE), lambda i: (0, 0)),
            pl.BlockSpec((LANE, LANE), lambda i: (0, 0)),
            pl.BlockSpec((1, LANE), lambda i: (0, 0)),
        ],
        out_specs=(
            pl.BlockSpec((tm, LANE), lambda i: (i, 0)),
            pl.BlockSpec((1, 1, LANE), lambda i: (i, 0, 0)),
            pl.BlockSpec((1, 1, LANE), lambda i: (i, 0, 0)),
        ),
        compiler_params=_compiler_params(),
    )(patches_bf16, w1, b1, w2, b2)
    return out[0], out[1], out[2], tm


def conv_bias_stats(patches_bf16, w, b):
    m, kdim = patches_bf16.shape
    tm = _pick_tm(m)
    n_tiles = m // tm
    out = pl.pallas_call(
        _conv_stats_kernel,
        out_shape=(
            jax.ShapeDtypeStruct((m, LANE), jnp.float32),
            jax.ShapeDtypeStruct((n_tiles, 1, LANE), jnp.float32),
            jax.ShapeDtypeStruct((n_tiles, 1, LANE), jnp.float32),
        ),
        grid=(n_tiles,),
        in_specs=[
            pl.BlockSpec((tm, kdim), lambda i: (i, 0)),
            pl.BlockSpec((kdim, LANE), lambda i: (0, 0)),
            pl.BlockSpec((1, LANE), lambda i: (0, 0)),
        ],
        out_specs=(
            pl.BlockSpec((tm, LANE), lambda i: (i, 0)),
            pl.BlockSpec((1, 1, LANE), lambda i: (i, 0, 0)),
            pl.BlockSpec((1, 1, LANE), lambda i: (i, 0, 0)),
        ),
        compiler_params=_compiler_params(),
    )(patches_bf16, w, b)
    return out[0], out[1], out[2], tm


def bn_swish(y, scale, shift):
    m = y.shape[0]
    tm = _pick_tm(m)
    n_tiles = m // tm
    return pl.pallas_call(
        _bn_swish_kernel,
        out_shape=jax.ShapeDtypeStruct((m, LANE), jnp.float32),
        grid=(n_tiles,),
        in_specs=[
            pl.BlockSpec((tm, LANE), lambda i: (i, 0)),
            pl.BlockSpec((1, LANE), lambda i: (0, 0)),
            pl.BlockSpec((1, LANE), lambda i: (0, 0)),
        ],
        out_specs=pl.BlockSpec((tm, LANE), lambda i: (i, 0)),
        compiler_params=_compiler_params(),
    )(y, scale, shift)


# ------------------------------ JAX glue -------------------------------------

def im2col_3x3(x_nhwc, stride):
    """3x3 patches, padding=1, given stride. Column ordering matches PyTorch
    weight layout after transpose (2,3,1,0): index = (kh*3 + kw)*Cin + cin."""
    n, h, w, c = x_nhwc.shape
    xp = jnp.pad(x_nhwc, ((0, 0), (1, 1), (1, 1), (0, 0)))
    ho = (h + 2 - 3) // stride + 1
    wo = (w + 2 - 3) // stride + 1
    cols = []
    for kh in range(3):
        for kw in range(3):
            cols.append(
                xp[:, kh:kh + (ho - 1) * stride + 1:stride,
                      kw:kw + (wo - 1) * stride + 1:stride, :])
    patches = jnp.concatenate(cols, axis=-1)                # (N, Ho, Wo, 9*C)
    return patches.reshape(n * ho * wo, 9 * c), (n, ho, wo)


def _bn_scale_shift(st_mean, st_css, tm, gamma_pad, beta_pad):
    """Merge per-tile (mean, centered-sum-of-squares) into global batch stats
    (equal tile counts -> exact group-variance decomposition), then fold the
    affine transform into a single per-channel scale/shift."""
    means = st_mean[:, 0, :]                                # (n_tiles, LANE)
    css = st_css[:, 0, :]
    n_tiles = means.shape[0]
    mean = jnp.mean(means, axis=0)
    m2 = jnp.sum(css, axis=0) + tm * jnp.sum((means - mean[None, :]) ** 2, axis=0)
    var = m2 / (tm * n_tiles)                               # biased (train-mode BN)
    rstd = jax.lax.rsqrt(var + BN_EPS)
    scale = gamma_pad * rstd
    shift = beta_pad - mean * scale
    return scale.reshape(1, LANE), shift.reshape(1, LANE)


def init_conv_params(key, cin, cout, k):
    """Deterministic synthetic init mimicking PyTorch Conv2d default ranges."""
    k1, k2 = jax.random.split(key)
    fan_in = cin * k * k
    bound = 1.0 / (fan_in ** 0.5)
    w = jax.random.uniform(k1, (cout, cin, k, k), jnp.float32, -bound, bound)
    b = jax.random.uniform(k2, (cout,), jnp.float32, -bound, bound)
    return w, b


def init_conv_block(key, cin, cout):
    k1, k2, k3 = jax.random.split(key, 3)
    w1, b1 = init_conv_params(k1, cin, cout, 3)             # Conv2d(cin, cout, 3, p=1)
    w2, b2 = init_conv_params(k2, cout, cout // 2, 1)       # Conv2d(cout, cout//2, 1)
    w3, b3 = init_conv_params(k3, cout // 2, cout, 3)       # Conv2d(cout//2, cout, 3, s=2, p=1)
    return {
        "w1": w1, "b1": b1,
        "w2": w2, "b2": b2,
        "g2": jnp.ones((cout // 2,), jnp.float32), "beta2": jnp.zeros((cout // 2,), jnp.float32),
        "w3": w3, "b3": b3,
        "g3": jnp.ones((cout,), jnp.float32), "beta3": jnp.zeros((cout,), jnp.float32),
    }


def prepare_conv_block_params(p, cin, cout):
    """Pad weights/biases/affine params to lane-aligned widths; weights in bf16."""
    assert cout <= LANE and cout % 2 == 0
    c_mid = cout // 2
    k1 = 9 * cin
    k1p = _round_up(k1, LANE)
    k3 = 9 * c_mid
    k3p = _round_up(k3, LANE)

    w1m = p["w1"].transpose(2, 3, 1, 0).reshape(k1, cout)
    w1m = jnp.pad(w1m, ((0, k1p - k1), (0, LANE - cout))).astype(jnp.bfloat16)
    b1 = jnp.pad(p["b1"], (0, LANE - cout)).reshape(1, LANE).astype(jnp.float32)

    w2m = p["w2"].reshape(c_mid, cout).T                    # (cout, c_mid)
    w2m = jnp.pad(w2m, ((0, LANE - cout), (0, LANE - c_mid))).astype(jnp.bfloat16)
    b2 = jnp.pad(p["b2"], (0, LANE - c_mid)).reshape(1, LANE).astype(jnp.float32)

    w3m = p["w3"].transpose(2, 3, 1, 0).reshape(k3, cout)
    w3m = jnp.pad(w3m, ((0, k3p - k3), (0, LANE - cout))).astype(jnp.bfloat16)
    b3 = jnp.pad(p["b3"], (0, LANE - cout)).reshape(1, LANE).astype(jnp.float32)

    # padded gamma entries are 0 -> padded lanes stay exactly zero after BN+Swish
    g2 = jnp.pad(p["g2"], (0, LANE - c_mid)).astype(jnp.float32)
    beta2 = jnp.pad(p["beta2"], (0, LANE - c_mid)).astype(jnp.float32)
    g3 = jnp.pad(p["g3"], (0, LANE - cout)).astype(jnp.float32)
    beta3 = jnp.pad(p["beta3"], (0, LANE - cout)).astype(jnp.float32)

    return {"w1": w1m, "b1": b1, "w2": w2m, "b2": b2, "w3": w3m, "b3": b3,
            "g2": g2, "beta2": beta2, "g3": g3, "beta3": beta3}


def conv_block_forward(x_nchw, prep, *, out_channel):
    cin = x_nchw.shape[1]
    c_mid = out_channel // 2
    k1p = _round_up(9 * cin, LANE)
    k3p = _round_up(9 * c_mid, LANE)

    x = jnp.transpose(x_nchw, (0, 2, 3, 1))                 # NHWC

    # --- Conv1 (3x3, p=1) + Conv2 (1x1) + bias, fused; BN1 partial stats ---
    patches, (n, ho, wo) = im2col_3x3(x, stride=1)
    patches = _pad_cols(patches, k1p).astype(jnp.bfloat16)
    y2, stm1, stc1, tm1 = conv12_fused(
        patches, prep["w1"], prep["b1"], prep["w2"], prep["b2"])

    # --- BN1 finalize (tiny glue) + normalize + Swish ---
    scale1, shift1 = _bn_scale_shift(stm1, stc1, tm1, prep["g2"], prep["beta2"])
    x2 = bn_swish(y2, scale1, shift1)                       # (N*H*W, LANE) f32

    # --- Conv3 (3x3, s=2, p=1) + bias; BN2 partial stats ---
    x2 = x2[:, :c_mid].reshape(n, ho, wo, c_mid)
    patches3, (n, ho2, wo2) = im2col_3x3(x2, stride=2)
    patches3 = _pad_cols(patches3, k3p).astype(jnp.bfloat16)
    y3, stm3, stc3, tm3 = conv_bias_stats(patches3, prep["w3"], prep["b3"])

    # --- BN2 finalize + normalize + Swish ---
    scale3, shift3 = _bn_scale_shift(stm3, stc3, tm3, prep["g3"], prep["beta3"])
    out = bn_swish(y3, scale3, shift3)                      # (N*Ho2*Wo2, LANE)

    out = out[:, :out_channel].reshape(n, ho2, wo2, out_channel)
    return jnp.transpose(out, (0, 3, 1, 2))                 # back to NCHW


# ------------------------------- driver --------------------------------------

if __name__ == "__main__":
    in_channel, out_channel = 4, 8                          # ConvBlock(4, 8)
    key = jax.random.PRNGKey(0)
    key_x, key_p = jax.random.split(key)

    x = jax.random.normal(key_x, (2, in_channel, 16, 16), jnp.float32)  # NCHW

    raw_params = init_conv_block(key_p, in_channel, out_channel)
    prep = prepare_conv_block_params(raw_params, in_channel, out_channel)

    fwd = jax.jit(functools.partial(conv_block_forward, out_channel=out_channel))
    out = jax.block_until_ready(fwd(x, prep))

    expected_shape = (2, out_channel, 8, 8)                 # stride-2 halves H, W
    assert out.shape == expected_shape, (out.shape, expected_shape)
    assert bool(jnp.all(jnp.isfinite(out)))
    print("KERNEL_OK")
</pallas_src>

<mosaic_0001>
module attributes {stable_mosaic.version = 11 : i64} {
  func.func @_conv12_stats_kernel(%arg0: i32, %arg1: memref<256x128xbf16, #tpu.memory_space<vmem>>, %arg2: memref<128x128xbf16, #tpu.memory_space<vmem>>, %arg3: memref<1x128xf32, #tpu.memory_space<vmem>>, %arg4: memref<128x128xbf16, #tpu.memory_space<vmem>>, %arg5: memref<1x128xf32, #tpu.memory_space<vmem>>, %arg6: memref<256x128xf32, #tpu.memory_space<vmem>>, %arg7: memref<1x1x128xf32, #tpu.memory_space<vmem>>, %arg8: memref<1x1x128xf32, #tpu.memory_space<vmem>>) attributes {dimension_semantics = [#tpu.dimension_semantics<parallel>], iteration_bounds = array<i64: 2>, scalar_prefetch = 0 : i64, scratch_operands = 0 : i64, tpu.core_type = #tpu.core_type<tc>, window_params = [{transform_indices = @transform_0, window_bounds = array<i64: 256, 128>}, {pipeline_mode = #tpu.pipeline_mode<synchronous>, transform_indices = @transform_1, window_bounds = array<i64: 128, 128>}, {pipeline_mode = #tpu.pipeline_mode<synchronous>, transform_indices = @transform_2, window_bounds = array<i64: 1, 128>}, {pipeline_mode = #tpu.pipeline_mode<synchronous>, transform_indices = @transform_3, window_bounds = array<i64: 128, 128>}, {pipeline_mode = #tpu.pipeline_mode<synchronous>, transform_indices = @transform_4, window_bounds = array<i64: 1, 128>}, {transform_indices = @transform_5, window_bounds = array<i64: 256, 128>}, {transform_indices = @transform_6, window_bounds = array<i64: 1, 1, 128>}, {transform_indices = @transform_7, window_bounds = array<i64: 1, 1, 128>}]} {
    %c0 = arith.constant 0 : index
    %c0_0 = arith.constant 0 : index
    %0 = vector.load %arg1[%c0, %c0_0] : memref<256x128xbf16, #tpu.memory_space<vmem>>, vector<256x128xbf16>
    %c0_1 = arith.constant 0 : index
    %c0_2 = arith.constant 0 : index
    %1 = vector.load %arg2[%c0_1, %c0_2] : memref<128x128xbf16, #tpu.memory_space<vmem>>, vector<128x128xbf16>
    %cst = arith.constant dense<0.000000e+00> : vector<256x128xf32>
    %2 = tpu.matmul %0, %1, %cst {dimension_numbers = #tpu.dot_dimension_numbers<[1], [0], [0], [1], [0, 0, 1, 1], [], []>} : vector<256x128xbf16>, vector<128x128xbf16>, vector<256x128xf32> -> vector<256x128xf32>
    %c0_3 = arith.constant 0 : index
    %c0_4 = arith.constant 0 : index
    %3 = vector.load %arg3[%c0_3, %c0_4] : memref<1x128xf32, #tpu.memory_space<vmem>>, vector<1x128xf32>
    %4 = vector.broadcast %3 : vector<1x128xf32> to vector<256x128xf32>
    %5 = arith.addf %2, %4 : vector<256x128xf32>
    %6 = arith.truncf %5 : vector<256x128xf32> to vector<256x128xbf16>
    %c0_5 = arith.constant 0 : index
    %c0_6 = arith.constant 0 : index
    %7 = vector.load %arg4[%c0_5, %c0_6] : memref<128x128xbf16, #tpu.memory_space<vmem>>, vector<128x128xbf16>
    %cst_7 = arith.constant dense<0.000000e+00> : vector<256x128xf32>
    %8 = tpu.matmul %6, %7, %cst_7 {dimension_numbers = #tpu.dot_dimension_numbers<[1], [0], [0], [1], [0, 0, 1, 1], [], []>} : vector<256x128xbf16>, vector<128x128xbf16>, vector<256x128xf32> -> vector<256x128xf32>
    %c0_8 = arith.constant 0 : index
    %c0_9 = arith.constant 0 : index
    %9 = vector.load %arg5[%c0_8, %c0_9] : memref<1x128xf32, #tpu.memory_space<vmem>>, vector<1x128xf32>
    %10 = vector.broadcast %9 : vector<1x128xf32> to vector<256x128xf32>
    %11 = arith.addf %8, %10 : vector<256x128xf32>
    %c0_10 = arith.constant 0 : index
    %c0_11 = arith.constant 0 : index
    %12 = vector.load %arg6[%c0_10, %c0_11] : memref<256x128xf32, #tpu.memory_space<vmem>>, vector<256x128xf32>
    tpu.vector_store %arg6[%c0_10, %c0_11], %11 {strides = array<i32>} : memref<256x128xf32, #tpu.memory_space<vmem>>, vector<256x128xf32>,
    %cst_12 = arith.constant dense<0.000000e+00> : vector<128xf32>
    %13 = vector.multi_reduction <add>, %11, %cst_12 [0] : vector<256x128xf32> to vector<128xf32>
    %14 = vector.shape_cast %13 : vector<128xf32> to vector<1x128xf32>
    %cst_13 = arith.constant 3.906250e-03 : f32
    %15 = vector.broadcast %cst_13 : f32 to vector<1x128xf32>
    %16 = arith.mulf %14, %15 : vector<1x128xf32>
    %17 = vector.broadcast %16 : vector<1x128xf32> to vector<256x128xf32>
    %18 = arith.subf %11, %17 : vector<256x128xf32>
    %19 = arith.mulf %18, %18 : vector<256x128xf32>
    %cst_14 = arith.constant dense<0.000000e+00> : vector<128xf32>
    %20 = vector.multi_reduction <add>, %19, %cst_14 [0] : vector<256x128xf32> to vector<128xf32>
    %21 = vector.shape_cast %20 : vector<128xf32> to vector<1x128xf32>
    %22 = vector.shape_cast %16 : vector<1x128xf32> to vector<1x1x128xf32>
    %c0_15 = arith.constant 0 : index
    %c0_16 = arith.constant 0 : index
    %c0_17 = arith.constant 0 : index
    %23 = vector.load %arg7[%c0_15, %c0_16, %c0_17] : memref<1x1x128xf32, #tpu.memory_space<vmem>>, vector<1x1x128xf32>
    tpu.vector_store %arg7[%c0_15, %c0_16, %c0_17], %22 {strides = array<i32>} : memref<1x1x128xf32, #tpu.memory_space<vmem>>, vector<1x1x128xf32>,
    %24 = vector.shape_cast %21 : vector<1x128xf32> to vector<1x1x128xf32>
    %c0_18 = arith.constant 0 : index
    %c0_19 = arith.constant 0 : index
    %c0_20 = arith.constant 0 : index
    %25 = vector.load %arg8[%c0_18, %c0_19, %c0_20] : memref<1x1x128xf32, #tpu.memory_space<vmem>>, vector<1x1x128xf32>
    tpu.vector_store %arg8[%c0_18, %c0_19, %c0_20], %24 {strides = array<i32>} : memref<1x1x128xf32, #tpu.memory_space<vmem>>, vector<1x1x128xf32>,
    return
  }
  func.func @transform_0(%arg0: i32) -> (i32, i32) {
    %c0_i32 = arith.constant 0 : i32
    %c0_i32_0 = arith.constant 0 : i32
    return %arg0, %c0_i32 : i32, i32
  }
  func.func @transform_1(%arg0: i32) -> (i32, i32) {
    %c0_i32 = arith.constant 0 : i32
    %c0_i32_0 = arith.constant 0 : i32
    %c0_i32_1 = arith.constant 0 : i32
    return %c0_i32, %c0_i32_0 : i32, i32
  }
  func.func @transform_2(%arg0: i32) -> (i32, i32) {
    %c0_i32 = arith.constant 0 : i32
    %c0_i32_0 = arith.constant 0 : i32
    %c0_i32_1 = arith.constant 0 : i32
    return %c0_i32, %c0_i32_0 : i32, i32
  }
  func.func @transform_3(%arg0: i32) -> (i32, i32) {
    %c0_i32 = arith.constant 0 : i32
    %c0_i32_0 = arith.constant 0 : i32
    %c0_i32_1 = arith.constant 0 : i32
    return %c0_i32, %c0_i32_0 : i32, i32
  }
  func.func @transform_4(%arg0: i32) -> (i32, i32) {
    %c0_i32 = arith.constant 0 : i32
    %c0_i32_0 = arith.constant 0 : i32
    %c0_i32_1 = arith.constant 0 : i32
    return %c0_i32, %c0_i32_0 : i32, i32
  }
  func.func @transform_5(%arg0: i32) -> (i32, i32) {
    %c0_i32 = arith.constant 0 : i32
    %c0_i32_0 = arith.constant 0 : i32
    return %arg0, %c0_i32 : i32, i32
  }
  func.func @transform_6(%arg0: i32) -> (i32, i32, i32) {
    %c0_i32 = arith.constant 0 : i32
    %c0_i32_0 = arith.constant 0 : i32
    %c0_i32_1 = arith.constant 0 : i32
    return %arg0, %c0_i32, %c0_i32_0 : i32, i32, i32
  }
  func.func @transform_7(%arg0: i32) -> (i32, i32, i32) {
    %c0_i32 = arith.constant 0 : i32
    %c0_i32_0 = arith.constant 0 : i32
    %c0_i32_1 = arith.constant 0 : i32
    return %arg0, %c0_i32, %c0_i32_0 : i32, i32, i32
  }
}

module attributes {stable_mosaic.version = 11 : i64} {
  func.func @_bn_swish_kernel(%arg0: i32, %arg1: memref<256x128xf32, #tpu.memory_space<vmem>>, %arg2: memref<1x128xf32, #tpu.memory_space<vmem>>, %arg3: memref<1x128xf32, #tpu.memory_space<vmem>>, %arg4: memref<256x128xf32, #tpu.memory_space<vmem>>) attributes {dimension_semantics = [#tpu.dimension_semantics<parallel>], iteration_bounds = array<i64: 2>, scalar_prefetch = 0 : i64, scratch_operands = 0 : i64, tpu.core_type = #tpu.core_type<tc>, window_params = [{transform_indices = @transform_0, window_bounds = array<i64: 256, 128>}, {pipeline_mode = #tpu.pipeline_mode<synchronous>, transform_indices = @transform_1, window_bounds = array<i64: 1, 128>}, {pipeline_mode = #tpu.pipeline_mode<synchronous>, transform_indices = @transform_2, window_bounds = array<i64: 1, 128>}, {transform_indices = @transform_3, window_bounds = array<i64: 256, 128>}]} {
    %c0 = arith.constant 0 : index
    %c0_0 = arith.constant 0 : index
    %0 = vector.load %arg1[%c0, %c0_0] : memref<256x128xf32, #tpu.memory_space<vmem>>, vector<256x128xf32>
    %c0_1 = arith.constant 0 : index
    %c0_2 = arith.constant 0 : index
    %1 = vector.load %arg2[%c0_1, %c0_2] : memref<1x128xf32, #tpu.memory_space<vmem>>, vector<1x128xf32>
    %2 = vector.broadcast %1 : vector<1x128xf32> to vector<256x128xf32>
    %3 = arith.mulf %0, %2 : vector<256x128xf32>
    %c0_3 = arith.constant 0 : index
    %c0_4 = arith.constant 0 : index
    %4 = vector.load %arg3[%c0_3, %c0_4] : memref<1x128xf32, #tpu.memory_space<vmem>>, vector<1x128xf32>
    %5 = vector.broadcast %4 : vector<1x128xf32> to vector<256x128xf32>
    %6 = arith.addf %3, %5 : vector<256x128xf32>
    %7 = arith.negf %6 : vector<256x128xf32>
    %8 = math.exp %7 : vector<256x128xf32>
    %cst = arith.constant 1.000000e+00 : f32
    %9 = vector.broadcast %cst : f32 to vector<256x128xf32>
    %10 = arith.addf %9, %8 : vector<256x128xf32>
    %11 = arith.divf %9, %10 : vector<256x128xf32>
    %12 = arith.mulf %6, %11 : vector<256x128xf32>
    %c0_5 = arith.constant 0 : index
    %c0_6 = arith.constant 0 : index
    %13 = vector.load %arg4[%c0_5, %c0_6] : memref<256x128xf32, #tpu.memory_space<vmem>>, vector<256x128xf32>
    tpu.vector_store %arg4[%c0_5, %c0_6], %12 {strides = array<i32>} : memref<256x128xf32, #tpu.memory_space<vmem>>, vector<256x128xf32>,
    return
  }
  func.func @transform_0(%arg0: i32) -> (i32, i32) {
    %c0_i32 = arith.constant 0 : i32
    %c0_i32_0 = arith.constant 0 : i32
    return %arg0, %c0_i32 : i32, i32
  }
  func.func @transform_1(%arg0: i32) -> (i32, i32) {
    %c0_i32 = arith.constant 0 : i32
    %c0_i32_0 = arith.constant 0 : i32
    %c0_i32_1 = arith.constant 0 : i32
    return %c0_i32, %c0_i32_0 : i32, i32
  }
  func.func @transform_2(%arg0: i32) -> (i32, i32) {
    %c0_i32 = arith.constant 0 : i32
    %c0_i32_0 = arith.constant 0 : i32
    %c0_i32_1 = arith.constant 0 : i32
    return %c0_i32, %c0_i32_0 : i32, i32
  }
  func.func @transform_3(%arg0: i32) -> (i32, i32) {
    %c0_i32 = arith.constant 0 : i32
    %c0_i32_0 = arith.constant 0 : i32
    return %arg0, %c0_i32 : i32, i32
  }
}

module attributes {stable_mosaic.version = 11 : i64} {
  func.func @_bn_swish_kernel(%arg0: i32, %arg1: memref<128x128xf32, #tpu.memory_space<vmem>>, %arg2: memref<1x128xf32, #tpu.memory_space<vmem>>, %arg3: memref<1x128xf32, #tpu.memory_space<vmem>>, %arg4: memref<128x128xf32, #tpu.memory_space<vmem>>) attributes {dimension_semantics = [#tpu.dimension_semantics<parallel>], iteration_bounds = array<i64: 1>, scalar_prefetch = 0 : i64, scratch_operands = 0 : i64, tpu.core_type = #tpu.core_type<tc>, window_params = [{transform_indices = @transform_0, window_bounds = array<i64: 128, 128>}, {pipeline_mode = #tpu.pipeline_mode<synchronous>, transform_indices = @transform_1, window_bounds = array<i64: 1, 128>}, {pipeline_mode = #tpu.pipeline_mode<synchronous>, transform_indices = @transform_2, window_bounds = array<i64: 1, 128>}, {transform_indices = @transform_3, window_bounds = array<i64: 128, 128>}]} {
    %c0 = arith.constant 0 : index
    %c0_0 = arith.constant 0 : index
    %0 = vector.load %arg1[%c0, %c0_0] : memref<128x128xf32, #tpu.memory_space<vmem>>, vector<128x128xf32>
    %c0_1 = arith.constant 0 : index
    %c0_2 = arith.constant 0 : index
    %1 = vector.load %arg2[%c0_1, %c0_2] : memref<1x128xf32, #tpu.memory_space<vmem>>, vector<1x128xf32>
    %2 = vector.broadcast %1 : vector<1x128xf32> to vector<128x128xf32>
    %3 = arith.mulf %0, %2 : vector<128x128xf32>
    %c0_3 = arith.constant 0 : index
    %c0_4 = arith.constant 0 : index
    %4 = vector.load %arg3[%c0_3, %c0_4] : memref<1x128xf32, #tpu.memory_space<vmem>>, vector<1x128xf32>
    %5 = vector.broadcast %4 : vector<1x128xf32> to vector<128x128xf32>
    %6 = arith.addf %3, %5 : vector<128x128xf32>
    %7 = arith.negf %6 : vector<128x128xf32>
    %8 = math.exp %7 : vector<128x128xf32>
    %cst = arith.constant 1.000000e+00 : f32
    %9 = vector.broadcast %cst : f32 to vector<128x128xf32>
    %10 = arith.addf %9, %8 : vector<128x128xf32>
    %11 = arith.divf %9, %10 : vector<128x128xf32>
    %12 = arith.mulf %6, %11 : vector<128x128xf32>
    %c0_5 = arith.constant 0 : index
    %c0_6 = arith.constant 0 : index
    %13 = vector.load %arg4[%c0_5, %c0_6] : memref<128x128xf32, #tpu.memory_space<vmem>>, vector<128x128xf32>
    tpu.vector_store %arg4[%c0_5, %c0_6], %12 {strides = array<i32>} : memref<128x128xf32, #tpu.memory_space<vmem>>, vector<128x128xf32>,
    return
  }
  func.func @transform_0(%arg0: i32) -> (i32, i32) {
    %c0_i32 = arith.constant 0 : i32
    %c0_i32_0 = arith.constant 0 : i32
    return %arg0, %c0_i32 : i32, i32
  }
  func.func @transform_1(%arg0: i32) -> (i32, i32) {
    %c0_i32 = arith.constant 0 : i32
    %c0_i32_0 = arith.constant 0 : i32
    %c0_i32_1 = arith.constant 0 : i32
    return %c0_i32, %c0_i32_0 : i32, i32
  }
  func.func @transform_2(%arg0: i32) -> (i32, i32) {
    %c0_i32 = arith.constant 0 : i32
    %c0_i32_0 = arith.constant 0 : i32
    %c0_i32_1 = arith.constant 0 : i32
    return %c0_i32, %c0_i32_0 : i32, i32
  }
  func.func @transform_3(%arg0: i32) -> (i32, i32) {
    %c0_i32 = arith.constant 0 : i32
    %c0_i32_0 = arith.constant 0 : i32
    return %arg0, %c0_i32 : i32, i32
  }
}

module attributes {stable_mosaic.version = 11 : i64} {
  func.func @_conv_stats_kernel(%arg0: i32, %arg1: memref<128x128xbf16, #tpu.memory_space<vmem>>, %arg2: memref<128x128xbf16, #tpu.memory_space<vmem>>, %arg3: memref<1x128xf32, #tpu.memory_space<vmem>>, %arg4: memref<128x128xf32, #tpu.memory_space<vmem>>, %arg5: memref<1x1x128xf32, #tpu.memory_space<vmem>>, %arg6: memref<1x1x128xf32, #tpu.memory_space<vmem>>) attributes {dimension_semantics = [#tpu.dimension_semantics<parallel>], iteration_bounds = array<i64: 1>, scalar_prefetch = 0 : i64, scratch_operands = 0 : i64, tpu.core_type = #tpu.core_type<tc>, window_params = [{transform_indices = @transform_0, window_bounds = array<i64: 128, 128>}, {pipeline_mode = #tpu.pipeline_mode<synchronous>, transform_indices = @transform_1, window_bounds = array<i64: 128, 128>}, {pipeline_mode = #tpu.pipeline_mode<synchronous>, transform_indices = @transform_2, window_bounds = array<i64: 1, 128>}, {transform_indices = @transform_3, window_bounds = array<i64: 128, 128>}, {transform_indices = @transform_4, window_bounds = array<i64: 1, 1, 128>}, {transform_indices = @transform_5, window_bounds = array<i64: 1, 1, 128>}]} {
    %c0 = arith.constant 0 : index
    %c0_0 = arith.constant 0 : index
    %0 = vector.load %arg1[%c0, %c0_0] : memref<128x128xbf16, #tpu.memory_space<vmem>>, vector<128x128xbf16>
    %c0_1 = arith.constant 0 : index
    %c0_2 = arith.constant 0 : index
    %1 = vector.load %arg2[%c0_1, %c0_2] : memref<128x128xbf16, #tpu.memory_space<vmem>>, vector<128x128xbf16>
    %cst = arith.constant dense<0.000000e+00> : vector<128x128xf32>
    %2 = tpu.matmul %0, %1, %cst {dimension_numbers = #tpu.dot_dimension_numbers<[1], [0], [0], [1], [0, 0, 1, 1], [], []>} : vector<128x128xbf16>, vector<128x128xbf16>, vector<128x128xf32> -> vector<128x128xf32>
    %c0_3 = arith.constant 0 : index
    %c0_4 = arith.constant 0 : index
    %3 = vector.load %arg3[%c0_3, %c0_4] : memref<1x128xf32, #tpu.memory_space<vmem>>, vector<1x128xf32>
    %4 = vector.broadcast %3 : vector<1x128xf32> to vector<128x128xf32>
    %5 = arith.addf %2, %4 : vector<128x128xf32>
    %c0_5 = arith.constant 0 : index
    %c0_6 = arith.constant 0 : index
    %6 = vector.load %arg4[%c0_5, %c0_6] : memref<128x128xf32, #tpu.memory_space<vmem>>, vector<128x128xf32>
    tpu.vector_store %arg4[%c0_5, %c0_6], %5 {strides = array<i32>} : memref<128x128xf32, #tpu.memory_space<vmem>>, vector<128x128xf32>,
    %cst_7 = arith.constant dense<0.000000e+00> : vector<128xf32>
    %7 = vector.multi_reduction <add>, %5, %cst_7 [0] : vector<128x128xf32> to vector<128xf32>
    %8 = vector.shape_cast %7 : vector<128xf32> to vector<1x128xf32>
    %cst_8 = arith.constant 7.812500e-03 : f32
    %9 = vector.broadcast %cst_8 : f32 to vector<1x128xf32>
    %10 = arith.mulf %8, %9 : vector<1x128xf32>
    %11 = vector.broadcast %10 : vector<1x128xf32> to vector<128x128xf32>
    %12 = arith.subf %5, %11 : vector<128x128xf32>
    %13 = arith.mulf %12, %12 : vector<128x128xf32>
    %cst_9 = arith.constant dense<0.000000e+00> : vector<128xf32>
    %14 = vector.multi_reduction <add>, %13, %cst_9 [0] : vector<128x128xf32> to vector<128xf32>
    %15 = vector.shape_cast %14 : vector<128xf32> to vector<1x128xf32>
    %16 = vector.shape_cast %10 : vector<1x128xf32> to vector<1x1x128xf32>
    %c0_10 = arith.constant 0 : index
    %c0_11 = arith.constant 0 : index
    %c0_12 = arith.constant 0 : index
    %17 = vector.load %arg5[%c0_10, %c0_11, %c0_12] : memref<1x1x128xf32, #tpu.memory_space<vmem>>, vector<1x1x128xf32>
    tpu.vector_store %arg5[%c0_10, %c0_11, %c0_12], %16 {strides = array<i32>} : memref<1x1x128xf32, #tpu.memory_space<vmem>>, vector<1x1x128xf32>,
    %18 = vector.shape_cast %15 : vector<1x128xf32> to vector<1x1x128xf32>
    %c0_13 = arith.constant 0 : index
    %c0_14 = arith.constant 0 : index
    %c0_15 = arith.constant 0 : index
    %19 = vector.load %arg6[%c0_13, %c0_14, %c0_15] : memref<1x1x128xf32, #tpu.memory_space<vmem>>, vector<1x1x128xf32>
    tpu.vector_store %arg6[%c0_13, %c0_14, %c0_15], %18 {strides = array<i32>} : memref<1x1x128xf32, #tpu.memory_space<vmem>>, vector<1x1x128xf32>,
    return
  }
  func.func @transform_0(%arg0: i32) -> (i32, i32) {
    %c0_i32 = arith.constant 0 : i32
    %c0_i32_0 = arith.constant 0 : i32
    return %arg0, %c0_i32 : i32, i32
  }
  func.func @transform_1(%arg0: i32) -> (i32, i32) {
    %c0_i32 = arith.constant 0 : i32
    %c0_i32_0 = arith.constant 0 : i32
    %c0_i32_1 = arith.constant 0 : i32
    return %c0_i32, %c0_i32_0 : i32, i32
  }
  func.func @transform_2(%arg0: i32) -> (i32, i32) {
    %c0_i32 = arith.constant 0 : i32
    %c0_i32_0 = arith.constant 0 : i32
    %c0_i32_1 = arith.constant 0 : i32
    return %c0_i32, %c0_i32_0 : i32, i32
  }
  func.func @transform_3(%arg0: i32) -> (i32, i32) {
    %c0_i32 = arith.constant 0 : i32
    %c0_i32_0 = arith.constant 0 : i32
    return %arg0, %c0_i32 : i32, i32
  }
  func.func @transform_4(%arg0: i32) -> (i32, i32, i32) {
    %c0_i32 = arith.constant 0 : i32
    %c0_i32_0 = arith.constant 0 : i32
    %c0_i32_1 = arith.constant 0 : i32
    return %arg0, %c0_i32, %c0_i32_0 : i32, i32, i32
  }
  func.func @transform_5(%arg0: i32) -> (i32, i32, i32) {
    %c0_i32 = arith.constant 0 : i32
    %c0_i32_0 = arith.constant 0 : i32
    %c0_i32_1 = arith.constant 0 : i32
    return %arg0, %c0_i32, %c0_i32_0 : i32, i32, i32
  }
}

</mosaic_0001>

<bundles_post_ra>
// kernel: conv_block_forward.5
= control target key start
LH: loop header
LB: loop body
LE: loop exit
PB: predicated region body
PF: predicated region fallthrough
CT: control target
= control target key end

     0   :  { %s805_s12 = smov 0   ;;  %s1099_s0 = inlined_call_operand.vmem [shape: f32[512,128], index: 0, kind: input, shape index: {}]   ;;  %s1100_s1 = inlined_call_operand.vmem [shape: f32[1,128], index: 1, kind: input, shape index: {}]   ;;  %s1101_s2 = inlined_call_operand.vmem [shape: f32[1,128], index: 2, kind: input, shape index: {}]   ;;  %s1102_s3 = inlined_call_operand.vmem [shape: f32[512,128], index: 3, kind: output, shape index: {}]  }
   0x1 LB: > { %s596_s13 = sadd.s32 4294967295, %s783_s12   ;;  %p600_p0 = scmp.ge.s32.totalorder %s783_s12, 1  ;;  %s783_s12 = sphi %s805_s12, %s13_s12  }
   0x2   : > { %p138_p1 = scmp.lt.s32.totalorder %s783_s12, 3 }
   0x4   : > { %p139_p2 = pnand %p600_p0, %p138_p1 }
   0x5   : > { %s601_s14 = sshll.u32 (!%p139_p2), %s596_s13, 5  ;;  %v819_v0 = vld [vmem:[%s1100_s1] ss:$0 sm:$0xff] (!%p139_p2) }
   0x6   : > { %142 = sbr.rel (%p139_p2) target bundleno = 107 (0x6b), region = 32  ;;  %p163_p3 = scmp.lt.s32.totalorder (!%p139_p2), %s601_s14, 63  ;;  %v831_v1 = vld [vmem:[%s1101_s2] ss:$0 sm:$0xff] (!%p139_p2) }
   0xd   : > { %s1104_s14 = smov (!%p163_p3, %s601_s14), 63 }
   0xe   : > { %s602_s15 = sshll.u32 %s1104_s14, 3 }
   0xf   : > { %s826_s20 = scalar_lea.vmem %s1099_s0, %s602_s15  ;;  %s959_s25 = scalar_lea.vmem %s1102_s3, %s602_s15 }
  0x10   : > { %v174_v2 = vld [vmem:[%s826_s20] sm:$0xff]  ;;  %v175_v3 = vld [vmem:[%s826_s20 + $0x8] sm:$0xff]  ;;  %v176_v4 = vld [vmem:[%s826_s20 + $0x10] sm:$0xff] }
  0x11   : > { %v213_v5 = vmul.f32 %v819_v0, %v174_v2  ;;  %v214_v6 = vmul.f32 %v819_v0, %v175_v3  ;;  %v215_v7 = vmul.f32 %v819_v0, %v176_v4  ;;  %v177_v8 = vld [vmem:[%s826_s20 + $0x18] sm:$0xff]  ;;  %v178_v9 = vld [vmem:[%s826_s20 + $0x20] sm:$0xff]  ;;  %v179_v10 = vld [vmem:[%s826_s20 + $0x28] sm:$0xff] }
  0x12   : > { %v216_v11 = vmul.f32 %v819_v0, %v177_v8  ;;  %v217_v12 = vmul.f32 %v819_v0, %v178_v9  ;;  %v218_v13 = vmul.f32 %v819_v0, %v179_v10  ;;  %v180_v14 = vld [vmem:[%s826_s20 + $0x30] sm:$0xff]  ;;  %v181_v15 = vld [vmem:[%s826_s20 + $0x38] sm:$0xff]  ;;  %v182_v20 = vld [vmem:[%s826_s20 + $0x40] sm:$0xff] }
  0x13   : > { %v848_v16 = vadd.f32 %v831_v1, %v213_v5  ;;  %v851_v17 = vadd.f32 %v831_v1, %v214_v6  ;;  %v854_v18 = vadd.f32 %v831_v1, %v215_v7  ;;  %v219_v19 = vmul.f32 %v819_v0, %v180_v14  ;;  %v183_v25 = vld [vmem:[%s826_s20 + $0x48] sm:$0xff]  ;;  %v184_v26 = vld [vmem:[%s826_s20 + $0x50] sm:$0xff]  ;;  %v185_v27 = vld [vmem:[%s826_s20 + $0x58] sm:$0xff] }
  0x14   : > { %v859_v21 = vadd.f32 %v831_v1, %v216_v11  ;;  %v862_v22 = vadd.f32 %v831_v1, %v217_v12  ;;  %v865_v23 = vadd.f32 %v831_v1, %v218_v13  ;;  %v220_v24 = vmul.f32 %v819_v0, %v181_v15  ;;  %v186_v35 = vld [vmem:[%s826_s20 + $0x60] sm:$0xff]  ;;  %v187_v53 = vld [vmem:[%s826_s20 + $0x68] sm:$0xff]  ;;  %v188_v55 = vld [vmem:[%s826_s20 + $0x70] sm:$0xff] }
  0x15   : > { %v607_v28 = vmul.f32 -1.442695, %v848_v16  ;;  %v608_v29 = vmul.f32 -1.442695, %v851_v17  ;;  %v609_v30 = vmul.f32 -1.442695, %v854_v18  ;;  %v875_v31 = vadd.f32 %v831_v1, %v219_v19 }
  0x16   : > { %v610_v32 = vmul.f32 -1.442695, %v859_v21  ;;  %v611_v33 = vmul.f32 -1.442695, %v862_v22  ;;  %v880_v34 = vadd.f32 %v831_v1, %v220_v24  ;;  %v612_v36 = vmul.f32 -1.442695, %v865_v23 }
  0x17   : > { %649 = vpow2.f32 %v607_v28  ;;  %v221_v37 = vmul.f32 %v819_v0, %v182_v20  ;;  %v222_v38 = vmul.f32 %v819_v0, %v183_v25  ;;  %v613_v39 = vmul.f32 -1.442695, %v875_v31  ;;  %v189_v56 = vld [vmem:[%s826_s20 + $0x78] sm:$0xff]  ;;  %v190_v61 = vld [vmem:[%s826_s20 + $0x80] sm:$0xff]  ;;  %v191_v4 = vld [vmem:[%s826_s20 + $0x88] sm:$0xff] }
  0x18   : > { %651 = vpow2.f32 %v608_v29  ;;  %v223_v40 = vmul.f32 %v819_v0, %v184_v26  ;;  %v224_v41 = vmul.f32 %v819_v0, %v185_v27  ;;  %v225_v44 = vmul.f32 %v819_v0, %v186_v35  ;;  %v192_v11 = vld [vmem:[%s826_s20 + $0x90] sm:$0xff]  ;;  %v193_v25 = vld [vmem:[%s826_s20 + $0x98] sm:$0xff]  ;;  %v194_v35 = vld [vmem:[%s826_s20 + $0xa0] sm:$0xff] }
  0x19   : > { %653 = vpow2.f32 %v609_v30  ;;  %v890_v42 = vadd.f32 %v831_v1, %v221_v37  ;;  %v893_v43 = vadd.f32 %v831_v1, %v222_v38  ;;  %v614_v45 = vmul.f32 -1.442695, %v880_v34 }
  0x1a   : > { %655 = vpow2.f32 %v610_v32  ;;  %v898_v46 = vadd.f32 %v831_v1, %v223_v40  ;;  %v901_v47 = vadd.f32 %v831_v1, %v224_v41  ;;  %v905_v49 = vadd.f32 %v831_v1, %v225_v44  ;;  %v195_v40 = vld [vmem:[%s826_s20 + $0xa8] sm:$0xff] }
  0x1b   : > { %657 = vpow2.f32 %v611_v33  ;;  %v615_v48 = vmul.f32 -1.442695, %v890_v42  ;;  %v616_v50 = vmul.f32 -1.442695, %v893_v43  ;;  %v226_v58 = vmul.f32 %v819_v0, %v187_v53 }
  0x1c   : > { %659 = vpow2.f32 %v612_v36  ;;  %v617_v51 = vmul.f32 -1.442695, %v898_v46  ;;  %v618_v52 = vmul.f32 -1.442695, %v901_v47  ;;  %v619_v54 = vmul.f32 -1.442695, %v905_v49 }
  0x1d   : > { %661 = vpow2.f32 %v613_v39  ;;  %v227_v2 = vmul.f32 %v819_v0, %v188_v55  ;;  %v228_v3 = vmul.f32 %v819_v0, %v189_v56  ;;  %v920_v9 = vadd.f32 %v831_v1, %v226_v58  ;;  %v197_v55 = vld [vmem:[%s826_s20 + $0xb8] sm:$0xff] }
  0x1e   : > { %663 = vpow2.f32 %v614_v45  ;;  %v229_v10 = vmul.f32 %v819_v0, %v190_v61  ;;  %v230_v14 = vmul.f32 %v819_v0, %v191_v4  ;;  %v231_v28 = vmul.f32 %v819_v0, %v192_v11 }
  0x1f   : > { %665 = vpow2.f32 %v615_v48  ;;  %v926_v20 = vadd.f32 %v831_v1, %v227_v2  ;;  %v929_v24 = vadd.f32 %v831_v1, %v228_v3  ;;  %v620_v32 = vmul.f32 -1.442695, %v920_v9  ;;  %v199_v3 = vld [vmem:[%s826_s20 + $0xc8] sm:$0xff] }
  0x20   : > { %667 = vpow2.f32 %v616_v50  ;;  %v935_v33 = vadd.f32 %v831_v1, %v229_v10  ;;  %v939_v38 = vadd.f32 %v831_v1, %v230_v14  ;;  %v232_v39 = vmul.f32 %v819_v0, %v193_v25  ;;  %v196_v50 = vld [vmem:[%s826_s20 + $0xb0] sm:$0xff] }
  0x21   : > { %v650_v57 = vpop.eup %649  ;;  %669 = vpow2.f32 %v617_v51  ;;  %v621_v45 = vmul.f32 -1.442695, %v926_v20  ;;  %v622_v48 = vmul.f32 -1.442695, %v929_v24  ;;  %v947_v53 = vadd.f32 %v831_v1, %v231_v28 }
  0x22   : > { %v652_v59 = vpop.eup %651  ;;  %v380_v60 = vadd.f32 1.0, %v650_v57  ;;  %671 = vpow2.f32 %v618_v52  ;;  %v623_v58 = vmul.f32 -1.442695, %v935_v33  ;;  %v235_v2 = vmul.f32 %v819_v0, %v196_v50 }
  0x23   : > { %v654_v62 = vpop.eup %653  ;;  %v381_v63 = vadd.f32 1.0, %v652_v59  ;;  %673 = vpow2.f32 %v619_v54  ;;  %v233_v54 = vmul.f32 %v819_v0, %v194_v35  ;;  %v234_v59 = vmul.f32 %v819_v0, %v195_v40 }
  0x24   : > { %v656_v5 = vpop.eup %655  ;;  %675 = vrcp.f32 %v380_v60  ;;  %v382_v6 = vadd.f32 1.0, %v654_v62  ;;  %v198_v60 = vld [vmem:[%s826_s20 + $0xc0] sm:$0xff]  ;;  %v625_v25 = vmul.f32 -1.442695, %v947_v53 }
  0x25   : > { %v658_v7 = vpop.eup %657  ;;  %677 = vrcp.f32 %v381_v63  ;;  %v383_v8 = vadd.f32 1.0, %v656_v5  ;;  %v624_v63 = vmul.f32 -1.442695, %v939_v38  ;;  %v971_v11 = vadd.f32 %v831_v1, %v233_v54 }
  0x26   : > { %v660_v12 = vpop.eup %659  ;;  %679 = vrcp.f32 %v382_v6  ;;  %v384_v13 = vadd.f32 1.0, %v658_v7  ;;  %v966_v6 = vadd.f32 %v831_v1, %v232_v39  ;;  %v236_v7 = vmul.f32 %v819_v0, %v197_v55 }
  0x27   : > { %v662_v15 = vpop.eup %661  ;;  %681 = vrcp.f32 %v383_v8  ;;  %v385_v19 = vadd.f32 1.0, %v660_v12  ;;  %v237_v12 = vmul.f32 %v819_v0, %v198_v60  ;;  %v977_v14 = vadd.f32 %v831_v1, %v234_v59 }
  0x28   : > { %v664_v26 = vpop.eup %663  ;;  %683 = vrcp.f32 %v384_v13  ;;  %v386_v27 = vadd.f32 1.0, %v662_v15  ;;  %v238_v15 = vmul.f32 %v819_v0, %v199_v3  ;;  %v626_v28 = vmul.f32 -1.442695, %v966_v6 }
  0x29   : > { %v666_v29 = vpop.eup %665  ;;  %685 = vrcp.f32 %v385_v19  ;;  %v387_v30 = vadd.f32 1.0, %v664_v26  ;;  %v984_v26 = vadd.f32 %v831_v1, %v235_v2  ;;  %v996_v35 = vadd.f32 %v831_v1, %v237_v12 }
  0x2a   : > { %v668_v36 = vpop.eup %667  ;;  %687 = vrcp.f32 %v386_v27  ;;  %v388_v37 = vadd.f32 1.0, %v666_v29  ;;  %v990_v29 = vadd.f32 %v831_v1, %v236_v7  ;;  %v1002_v39 = vadd.f32 %v831_v1, %v238_v15  ;;  %v205_v15 = vld [vmem:[%s826_s20 + $0xf8] sm:$0xff] }
  0x2b   : > { %v670_v41 = vpop.eup %669  ;;  %689 = vrcp.f32 %v387_v30  ;;  %v389_v44 = vadd.f32 1.0, %v668_v36 }
  0x2c   : > { %v672_v51 = vpop.eup %671  ;;  %691 = vrcp.f32 %v388_v37  ;;  %v390_v52 = vadd.f32 1.0, %v670_v41  ;;  %v628_v37 = vmul.f32 -1.442695, %v977_v14  ;;  %v629_v41 = vmul.f32 -1.442695, %v984_v26 }
  0x2d   : > { %v674_v56 = vpop.eup %673  ;;  %693 = vrcp.f32 %v389_v44  ;;  %v391_v57 = vadd.f32 1.0, %v672_v51 }
  0x2e   : > { %v676_v61 = vpop.eup %675  ;;  %695 = vrcp.f32 %v390_v52  ;;  %v392_v62 = vadd.f32 1.0, %v674_v56 }
  0x2f   : > { %v678_v4 = vpop.eup %677  ;;  %v476_v5 = vmul.f32 %v676_v61, %v848_v16  ;;  %697 = vrcp.f32 %v391_v57  ;;  %v201_v61 = vld [vmem:[%s826_s20 + $0xd8] sm:$0xff] }
  0x30   : > { %v680_v8 = vpop.eup %679  ;;  %v477_v10 = vmul.f32 %v678_v4, %v851_v17  ;;  %699 = vrcp.f32 %v392_v62  ;;  %v203_v4 = vld [vmem:[%s826_s20 + $0xe8] sm:$0xff] }
  0x31   : > { %v682_v13 = vpop.eup %681  ;;  %508 = vst [vmem:[%s959_s25] sm:$0xff] %v476_v5  ;;  %v478_v16 = vmul.f32 %v680_v8, %v854_v18  ;;  %701 = vpow2.f32 %v620_v32  ;;  %v627_v32 = vmul.f32 -1.442695, %v971_v11  ;;  %v240_v8 = vmul.f32 %v819_v0, %v201_v61 }
  0x32   : > { %v684_v19 = vpop.eup %683  ;;  %509 = vst [vmem:[%s959_s25 + $0x8] sm:$0xff] %v477_v10  ;;  %v479_v17 = vmul.f32 %v682_v13, %v859_v21  ;;  %703 = vpow2.f32 %v621_v45  ;;  %v204_v10 = vld [vmem:[%s826_s20 + $0xf0] sm:$0xff] }
  0x33   : > { %v686_v27 = vpop.eup %685  ;;  %510 = vst [vmem:[%s959_s25 + $0x10] sm:$0xff] %v478_v16  ;;  %v480_v18 = vmul.f32 %v684_v19, %v862_v22  ;;  %705 = vpow2.f32 %v622_v48 }
  0x34   : > { %v688_v30 = vpop.eup %687  ;;  %511 = vst [vmem:[%s959_s25 + $0x18] sm:$0xff] %v479_v17  ;;  %v481_v21 = vmul.f32 %v686_v27, %v865_v23  ;;  %707 = vpow2.f32 %v623_v58 }
  0x35   : > { %v690_v36 = vpop.eup %689  ;;  %512 = vst [vmem:[%s959_s25 + $0x20] sm:$0xff] %v480_v18  ;;  %v482_v22 = vmul.f32 %v688_v30, %v875_v31  ;;  %709 = vpow2.f32 %v624_v63  ;;  %v630_v31 = vmul.f32 -1.442695, %v990_v29  ;;  %v202_v63 = vld [vmem:[%s826_s20 + $0xe0] sm:$0xff]  ;;  %v243_v30 = vmul.f32 %v819_v0, %v204_v10 }
  0x36   : > { %v692_v40 = vpop.eup %691  ;;  %513 = vst [vmem:[%s959_s25 + $0x28] sm:$0xff] %v481_v21  ;;  %v483_v23 = vmul.f32 %v690_v36, %v880_v34  ;;  %711 = vpow2.f32 %v625_v25  ;;  %v631_v34 = vmul.f32 -1.442695, %v996_v35  ;;  %v241_v16 = vmul.f32 %v819_v0, %v202_v63 }
  0x37   : > { %v694_v44 = vpop.eup %693  ;;  %514 = vst [vmem:[%s959_s25 + $0x30] sm:$0xff] %v482_v22  ;;  %v484_v45 = vmul.f32 %v692_v40, %v890_v42  ;;  %713 = vpow2.f32 %v626_v28  ;;  %v632_v42 = vmul.f32 -1.442695, %v1002_v39  ;;  %v242_v25 = vmul.f32 %v819_v0, %v203_v4 }
  0x38   : > { %v696_v48 = vpop.eup %695  ;;  %515 = vst [vmem:[%s959_s25 + $0x38] sm:$0xff] %v483_v23  ;;  %v485_v50 = vmul.f32 %v694_v44, %v893_v43  ;;  %715 = vpow2.f32 %v627_v32  ;;  %v1037_v36 = vadd.f32 %v831_v1, %v240_v8  ;;  %v244_v22 = vmul.f32 %v819_v0, %v205_v15 }
  0x39   : > { %v698_v51 = vpop.eup %697  ;;  %516 = vst [vmem:[%s959_s25 + $0x40] sm:$0xff] %v484_v45  ;;  %v486_v52 = vmul.f32 %v696_v48, %v898_v46  ;;  %717 = vpow2.f32 %v628_v37  ;;  %v200_v46 = vld [vmem:[%s826_s20 + $0xd0] sm:$0xff]  ;;  %v1041_v23 = vadd.f32 %v831_v1, %v241_v16  ;;  %v1044_v45 = vadd.f32 %v831_v1, %v242_v25 }
  0x3a   : > { %v700_v54 = vpop.eup %699  ;;  %517 = vst [vmem:[%s959_s25 + $0x48] sm:$0xff] %v485_v50  ;;  %v487_v55 = vmul.f32 %v698_v51, %v901_v47  ;;  %719 = vpow2.f32 %v629_v41  ;;  %v239_v3 = vmul.f32 %v819_v0, %v200_v46  ;;  %v1048_v0 = vadd.f32 %v831_v1, %v243_v30 }
  0x3b   : > { %v702_v43 = vpop.eup %701  ;;  %518 = vst [vmem:[%s959_s25 + $0x50] sm:$0xff] %v486_v52  ;;  %v488_v56 = vmul.f32 %v700_v54, %v905_v49  ;;  %721 = vpow2.f32 %v630_v31  ;;  %v634_v52 = vmul.f32 -1.442695, %v1037_v36 }
  0x3c   : > { %v704_v57 = vpop.eup %703  ;;  %519 = vst [vmem:[%s959_s25 + $0x58] sm:$0xff] %v487_v55  ;;  %v393_v58 = vadd.f32 1.0, %v702_v43  ;;  %723 = vpow2.f32 %v631_v34  ;;  %v1033_v28 = vadd.f32 %v831_v1, %v239_v3  ;;  %v635_v43 = vmul.f32 -1.442695, %v1041_v23 }
  0x3d   : > { %v706_v59 = vpop.eup %705  ;;  %520 = vst [vmem:[%s959_s25 + $0x60] sm:$0xff] %v488_v56  ;;  %v394_v60 = vadd.f32 1.0, %v704_v57  ;;  %725 = vpow2.f32 %v632_v42  ;;  %v1052_v42 = vadd.f32 %v831_v1, %v244_v22  ;;  %v637_v1 = vmul.f32 -1.442695, %v1048_v0 }
  0x3e   : > { %v708_v47 = vpop.eup %707  ;;  %727 = vrcp.f32 %v393_v58  ;;  %v395_v62 = vadd.f32 1.0, %v706_v59  ;;  %v633_v50 = vmul.f32 -1.442695, %v1033_v28  ;;  %v636_v58 = vmul.f32 -1.442695, %v1044_v45 }
  0x3f   : > { %v710_v2 = vpop.eup %709  ;;  %729 = vrcp.f32 %v394_v60  ;;  %v396_v49 = vadd.f32 1.0, %v708_v47 }
  0x40   : > { %v712_v5 = vpop.eup %711  ;;  %731 = vrcp.f32 %v395_v62  ;;  %v397_v7 = vadd.f32 1.0, %v710_v2 }
  0x41   : > { %v714_v12 = vpop.eup %713  ;;  %733 = vrcp.f32 %v396_v49  ;;  %v398_v13 = vadd.f32 1.0, %v712_v5 }
  0x42   : > { %v716_v19 = vpop.eup %715  ;;  %735 = vrcp.f32 %v397_v7  ;;  %v399_v17 = vadd.f32 1.0, %v714_v12 }
  0x43   : > { %v718_v27 = vpop.eup %717  ;;  %737 = vrcp.f32 %v398_v13  ;;  %v400_v18 = vadd.f32 1.0, %v716_v19 }
  0x44   : > { %v720_v21 = vpop.eup %719  ;;  %739 = vrcp.f32 %v399_v17  ;;  %v401_v32 = vadd.f32 1.0, %v718_v27 }
  0x45   : > { %v722_v37 = vpop.eup %721  ;;  %741 = vrcp.f32 %v400_v18  ;;  %v402_v40 = vadd.f32 1.0, %v720_v21 }
  0x46   : > { %v724_v41 = vpop.eup %723  ;;  %743 = vrcp.f32 %v401_v32  ;;  %v403_v44 = vadd.f32 1.0, %v722_v37 }
  0x47   : > { %v726_v31 = vpop.eup %725  ;;  %745 = vrcp.f32 %v402_v40  ;;  %v404_v48 = vadd.f32 1.0, %v724_v41 }
  0x48   : > { %v728_v34 = vpop.eup %727  ;;  %747 = vrcp.f32 %v403_v44  ;;  %v405_v51 = vadd.f32 1.0, %v726_v31 }
  0x49   : > { %v730_v54 = vpop.eup %729  ;;  %v489_v55 = vmul.f32 %v728_v34, %v920_v9  ;;  %749 = vrcp.f32 %v404_v48 }
  0x4a   : > { %v732_v56 = vpop.eup %731  ;;  %v490_v57 = vmul.f32 %v730_v54, %v926_v20  ;;  %751 = vrcp.f32 %v405_v51  ;;  %v638_v20 = vmul.f32 -1.442695, %v1052_v42 }
  0x4b   : > { %v734_v46 = vpop.eup %733  ;;  %521 = vst [vmem:[%s959_s25 + $0x68] sm:$0xff] %v489_v55  ;;  %v491_v59 = vmul.f32 %v732_v56, %v929_v24  ;;  %753 = vpow2.f32 %v633_v50 }
  0x4c   : > { %v736_v9 = vpop.eup %735  ;;  %522 = vst [vmem:[%s959_s25 + $0x70] sm:$0xff] %v490_v57  ;;  %v492_v60 = vmul.f32 %v734_v46, %v935_v33  ;;  %755 = vpow2.f32 %v634_v52 }
  0x4d   : > { %v738_v61 = vpop.eup %737  ;;  %523 = vst [vmem:[%s959_s25 + $0x78] sm:$0xff] %v491_v59  ;;  %v493_v47 = vmul.f32 %v736_v9, %v939_v38  ;;  %757 = vpow2.f32 %v635_v43 }
  0x4e   : > { %v740_v62 = vpop.eup %739  ;;  %524 = vst [vmem:[%s959_s25 + $0x80] sm:$0xff] %v492_v60  ;;  %v494_v24 = vmul.f32 %v738_v61, %v947_v53  ;;  %759 = vpow2.f32 %v636_v58 }
  0x4f   : > { %v742_v63 = vpop.eup %741  ;;  %525 = vst [vmem:[%s959_s25 + $0x88] sm:$0xff] %v493_v47  ;;  %v495_v33 = vmul.f32 %v740_v62, %v966_v6  ;;  %761 = vpow2.f32 %v637_v1 }
  0x50   : > { %v744_v2 = vpop.eup %743  ;;  %526 = vst [vmem:[%s959_s25 + $0x90] sm:$0xff] %v494_v24  ;;  %v496_v49 = vmul.f32 %v742_v63, %v971_v11  ;;  %763 = vpow2.f32 %v638_v20 }
  0x51   : > { %v746_v38 = vpop.eup %745  ;;  %527 = vst [vmem:[%s959_s25 + $0x98] sm:$0xff] %v495_v33  ;;  %v497_v3 = vmul.f32 %v744_v2, %v977_v14 }
  0x52   : > { %v748_v53 = vpop.eup %747  ;;  %528 = vst [vmem:[%s959_s25 + $0xa0] sm:$0xff] %v496_v49  ;;  %v498_v4 = vmul.f32 %v746_v38, %v984_v26 }
  0x53   : > { %v750_v5 = vpop.eup %749  ;;  %529 = vst [vmem:[%s959_s25 + $0xa8] sm:$0xff] %v497_v3  ;;  %v499_v6 = vmul.f32 %v748_v53, %v990_v29 }
  0x54   : > { %v752_v7 = vpop.eup %751  ;;  %530 = vst [vmem:[%s959_s25 + $0xb0] sm:$0xff] %v498_v4  ;;  %v500_v8 = vmul.f32 %v750_v5, %v996_v35 }
  0x55   : > { %v754_v11 = vpop.eup %753  ;;  %531 = vst [vmem:[%s959_s25 + $0xb8] sm:$0xff] %v499_v6  ;;  %v501_v10 = vmul.f32 %v752_v7, %v1002_v39 }
  0x56   : > { %v756_v12 = vpop.eup %755  ;;  %532 = vst [vmem:[%s959_s25 + $0xc0] sm:$0xff] %v500_v8  ;;  %v406_v14 = vadd.f32 1.0, %v754_v11 }
  0x57   : > { %v758_v13 = vpop.eup %757  ;;  %533 = vst [vmem:[%s959_s25 + $0xc8] sm:$0xff] %v501_v10  ;;  %v407_v16 = vadd.f32 1.0, %v756_v12 }
  0x58   : > { %v760_v15 = vpop.eup %759  ;;  %765 = vrcp.f32 %v406_v14  ;;  %v408_v26 = vadd.f32 1.0, %v758_v13 }
  0x59   : > { %v762_v19 = vpop.eup %761  ;;  %767 = vrcp.f32 %v407_v16  ;;  %v409_v29 = vadd.f32 1.0, %v760_v15 }
  0x5a   : > { %v764_v17 = vpop.eup %763  ;;  %769 = vrcp.f32 %v408_v26  ;;  %v410_v35 = vadd.f32 1.0, %v762_v19 }
  0x5b   : > { %771 = vrcp.f32 %v409_v29  ;;  %v411_v39 = vadd.f32 1.0, %v764_v17 }
  0x5c   : > { %773 = vrcp.f32 %v410_v35 }
  0x5d   : > { %775 = vrcp.f32 %v411_v39 }
  0x62   : > { %v766_v25 = vpop.eup %765 }
  0x63   : > { %v768_v27 = vpop.eup %767  ;;  %v502_v18 = vmul.f32 %v766_v25, %v1033_v28 }
  0x64   : > { %v770_v30 = vpop.eup %769  ;;  %v503_v21 = vmul.f32 %v768_v27, %v1037_v36 }
  0x65   : > { %v772_v32 = vpop.eup %771  ;;  %534 = vst [vmem:[%s959_s25 + $0xd0] sm:$0xff] %v502_v18  ;;  %v504_v22 = vmul.f32 %v770_v30, %v1041_v23 }
  0x66   : > { %v774_v37 = vpop.eup %773  ;;  %535 = vst [vmem:[%s959_s25 + $0xd8] sm:$0xff] %v503_v21  ;;  %v505_v40 = vmul.f32 %v772_v32, %v1044_v45 }
  0x67   : > { %v776_v41 = vpop.eup %775  ;;  %536 = vst [vmem:[%s959_s25 + $0xe0] sm:$0xff] %v504_v22  ;;  %v506_v44 = vmul.f32 %v774_v37, %v1048_v0 }
  0x68   : > { %537 = vst [vmem:[%s959_s25 + $0xe8] sm:$0xff] %v505_v40  ;;  %v507_v31 = vmul.f32 %v776_v41, %v1052_v42 }
  0x69   : > { %538 = vst [vmem:[%s959_s25 + $0xf0] sm:$0xff] %v506_v44 }
  0x6a   : > { %539 = vst [vmem:[%s959_s25 + $0xf8] sm:$0xff] %v507_v31 }
  0x6b PF: > { %s13_s12 = sadd.s32 1, %s783_s12  }
  0x6c   : > { %p10_p4 = scmp.ge.s32.totalorder %s13_s12, 4  }
  0x6e   :  { %12 = sbr.rel (!%p10_p4) target bundleno = 1 (0x1), region = 62 }

// kernel: conv_block_forward.4
= control target key start
LH: loop header
LB: loop body
LE: loop exit
PB: predicated region body
PF: predicated region fallthrough
CT: control target
= control target key end

     0   :  { %s1464_s24 = smov 0   ;;  %s1821_s0 = inlined_call_operand.vmem [shape: bf16[512,128], index: 0, kind: input, shape index: {}]   ;;  %s1822_s1 = inlined_call_operand.vmem [shape: bf16[128,128], index: 1, kind: input, shape index: {}]   ;;  %s1823_s2 = inlined_call_operand.vmem [shape: f32[1,128], index: 2, kind: input, shape index: {}]   ;;  %s1824_s3 = inlined_call_operand.vmem [shape: bf16[128,128], index: 3, kind: input, shape index: {}]   ;;  %s1825_s4 = inlined_call_operand.vmem [shape: f32[1,128], index: 4, kind: input, shape index: {}]   ;;  %s1826_s5 = inlined_call_operand.vmem [shape: f32[512,128], index: 5, kind: output, shape index: {0}]   ;;  %s1827_s6 = inlined_call_operand.vmem [shape: f32[2,1,128], index: 6, kind: output, shape index: {1}]   ;;  %s1828_s7 = inlined_call_operand.vmem [shape: f32[2,1,128], index: 7, kind: output, shape index: {2}]  }
   0x1 LB: > { %s1470_s25 = sadd.s32 4294967295, %s1422_s24   ;;  %p1191_p0 = scmp.ge.s32.totalorder %s1422_s24, 1  ;;  %s1422_s24 = sphi %s1464_s24, %s18_s24  }
   0x2   : > { %p243_p1 = scmp.lt.s32.totalorder %s1422_s24, 3 }
   0x4   : > { %p244_p2 = pnand %p1191_p0, %p243_p1 }
   0x5   : > { %v1384_v0 = vld [vmem:[%s1822_s1] sm:$0xff] (!%p244_p2)   ;;  %s1192_s28 = sshll.u32 (!%p244_p2), %s1470_s25, 5  ;;  %v1385_v1 = vld [vmem:[%s1822_s1 + $0x8] sm:$0xff] (!%p244_p2)   ;;  %v1386_v2 = vld [vmem:[%s1822_s1 + $0x10] sm:$0xff] (!%p244_p2)   ;;  %p293_p4 = scmp.lt.s32.totalorder (!%p244_p2), %s1470_s25, 1 }
   0x6   : > { %247 = sbr.rel (%p244_p2) target bundleno = 636 (0x27c), region = 40  ;;  %p282_p3 = scmp.lt.s32.totalorder (!%p244_p2), %s1192_s28, 63  ;;  %1280 = vmatprep.subr.bf16.mxu0 (!%p244_p2), %v1384_v0  ;;  %v1387_v3 = vld [vmem:[%s1822_s1 + $0x18] sm:$0xff] (!%p244_p2)   ;;  %v1388_v5 = vld [vmem:[%s1822_s1 + $0x20] sm:$0xff] (!%p244_p2)   ;;  %v1389_v6 = vld [vmem:[%s1822_s1 + $0x28] sm:$0xff] (!%p244_p2)  }
   0x7   : > { %1281 = vmatpush3.bf16.msra.mxu0 (!%p244_p2), %v1384_v0  ;;  %v1390_v7 = vld [vmem:[%s1822_s1 + $0x30] sm:$0xff] (!%p244_p2)   ;;  %v1391_v8 = vld [vmem:[%s1822_s1 + $0x38] sm:$0xff] (!%p244_p2)   ;;  %v1408_v9 = vld [vmem:[%s1824_s3] sm:$0xff] (!%p244_p2)  }
   0x8   : > { %1282 = vmatprep.subr.bf16.mxu0 (!%p244_p2), %v1385_v1  ;;  %v1409_v10 = vld [vmem:[%s1824_s3 + $0x8] sm:$0xff] (!%p244_p2)   ;;  %1328 = vmatprep.subr.bf16.mxu1 (!%p244_p2), %v1408_v9  ;;  %v1410_v11 = vld [vmem:[%s1824_s3 + $0x10] sm:$0xff] (!%p244_p2)   ;;  %v1411_v14 = vld [vmem:[%s1824_s3 + $0x18] sm:$0xff] (!%p244_p2)  }
   0x9   : > { %1329 = vmatpush3.bf16.msra.mxu1 (!%p244_p2), %v1408_v9  ;;  %v1412_v15 = vld [vmem:[%s1824_s3 + $0x20] sm:$0xff] (!%p244_p2)   ;;  %v1413_v18 = vld [vmem:[%s1824_s3 + $0x28] sm:$0xff] (!%p244_p2)   ;;  %v1414_v30 = vld [vmem:[%s1824_s3 + $0x30] sm:$0xff] (!%p244_p2)  }
   0xa   : > { %1330 = vmatprep.subr.bf16.mxu1 (!%p244_p2), %v1409_v10  ;;  %v1415_v31 = vld [vmem:[%s1824_s3 + $0x38] sm:$0xff] (!%p244_p2)   ;;  %v1550_v33 = vld [vmem:[%s1823_s2] ss:$0 sm:$0xff] (!%p244_p2) }
   0xb   : > { %1283 = vmatpush3.bf16.msra.mxu0 (!%p244_p2), %v1385_v1 }
   0xc   : > { %1284 = vmatprep.subr.bf16.mxu0 (!%p244_p2), %v1386_v2 }
   0xd   : > { %s1830_s28 = smov (!%p282_p3, %s1192_s28), 63  ;;  %1331 = vmatpush3.bf16.msra.mxu1 %v1409_v10  ;;  %s1832_s25 = smov (!%p293_p4, %s1470_s25), 1 }
   0xe   : > { %s1193_s10 = sshll.u32 %s1830_s28, 2  ;;  %1332 = vmatprep.subr.bf16.mxu1 %v1410_v11  ;;  %s295_s9 = scalar_lea.vmem %s1827_s6, %s1832_s25 }
   0xf   : > { %s1490_s13 = scalar_lea.vmem %s1821_s0, %s1193_s10  ;;  %1285 = vmatpush3.bf16.msra.mxu0 %v1386_v2  ;;  %s298_s12 = scalar_lea.vmem %s1828_s7, %s1832_s25 }
  0x10   : > { %v1392_v4 = vld [vmem:[%s1490_s13] sm:$0xff]   ;;  %1286 = vmatprep.subr.bf16.mxu0 %v1387_v3  ;;  %v1393_v12 = vld [vmem:[%s1490_s13 + $0x8] sm:$0xff]   ;;  %v1394_v13 = vld [vmem:[%s1490_s13 + $0x10] sm:$0xff]  }
  0x11   : > { %1296 = vmatprep.mubr.bf16.mxu0 %v1392_v4  ;;  %1333 = vmatpush3.bf16.msra.mxu1 %v1410_v11  ;;  %v1395_v16 = vld [vmem:[%s1490_s13 + $0x18] sm:$0xff]   ;;  %v1396_v17 = vld [vmem:[%s1490_s13 + $0x20] sm:$0xff]   ;;  %v1397_v19 = vld [vmem:[%s1490_s13 + $0x28] sm:$0xff]  }
  0x12   : > { %1334 = vmatprep.subr.bf16.mxu1 %v1411_v14  ;;  %v1398_v20 = vld [vmem:[%s1490_s13 + $0x30] sm:$0xff]   ;;  %v1399_v21 = vld [vmem:[%s1490_s13 + $0x38] sm:$0xff]   ;;  %v1400_v22 = vld [vmem:[%s1490_s13 + $0x40] sm:$0xff]  }
  0x13   : > { %1287 = vmatpush3.bf16.msra.mxu0 %v1387_v3  ;;  %v1401_v23 = vld [vmem:[%s1490_s13 + $0x48] sm:$0xff]   ;;  %v1402_v24 = vld [vmem:[%s1490_s13 + $0x50] sm:$0xff]   ;;  %v1403_v25 = vld [vmem:[%s1490_s13 + $0x58] sm:$0xff]  }
  0x14   : > { %1288 = vmatprep.subr.bf16.mxu0 %v1388_v5  ;;  %v1404_v26 = vld [vmem:[%s1490_s13 + $0x60] sm:$0xff]   ;;  %v1405_v27 = vld [vmem:[%s1490_s13 + $0x68] sm:$0xff]   ;;  %v1406_v28 = vld [vmem:[%s1490_s13 + $0x70] sm:$0xff]  }
  0x15   : > { %1335 = vmatpush3.bf16.msra.mxu1 %v1411_v14  ;;  %v1407_v29 = vld [vmem:[%s1490_s13 + $0x78] sm:$0xff]   ;;  %s1195_s13 = sshll.u32 %s1830_s28, 3 }
  0x16   : > { %1336 = vmatprep.subr.bf16.mxu1 %v1412_v15  ;;  %s1593_s30 = scalar_lea.vmem %s1826_s5, %s1195_s13 }
  0x17   : > { %1289 = vmatpush3.bf16.msra.mxu0 %v1388_v5 }
  0x18   : > { %1290 = vmatprep.subr.bf16.mxu0 %v1389_v6 }
  0x19   : > { %1337 = vmatpush3.bf16.msra.mxu1 %v1412_v15 }
  0x1a   : > { %1338 = vmatprep.subr.bf16.mxu1 %v1413_v18 }
  0x1b   : > { %1291 = vmatpush3.bf16.msra.mxu0 %v1389_v6 }
  0x1c   : > { %1292 = vmatprep.subr.bf16.mxu0 %v1390_v7 }
  0x1d   : > { %1339 = vmatpush3.bf16.msra.mxu1 %v1413_v18 }
  0x1e   : > { %1340 = vmatprep.subr.bf16.mxu1 %v1414_v30 }
  0x1f   : > { %1293 = vmatpush3.bf16.msra.mxu0 %v1390_v7 }
  0x20   : > { %1294 = vmatprep.subr.bf16.mxu0 %v1391_v8 }
  0x21   : > { %1341 = vmatpush3.bf16.msra.mxu1 %v1414_v30 }
  0x22   : > { %1342 = vmatprep.subr.bf16.mxu1 %v1415_v31 }
  0x23   : > { %1295 = vmatpush3.bf16.msra.mxu0 %v1391_v8 }
  0x25   : > { %1343 = vmatpush3.bf16.msra.mxu1 %v1415_v31 }
  0x26   : > { %1297 = vmatmul.mubr.bf16.vlgmr.msra.gmra.mrb[0].mxu0 %v1393_v12 }
  0x27   : > { %1300 = vmatprep.mubr.bf16.mxu0 %v1394_v13 }
  0x2e   : > { %1301 = vmatmul.mubr.bf16.gmra.mrb[4].mxu0 %v1395_v16 }
  0x2f   : > { %1304 = vmatprep.mubr.bf16.mxu0 %v1396_v17 }
  0x36   : > { %1305 = vmatmul.mubr.bf16.gmra.mrb[8].mxu0 %v1397_v19 }
  0x37   : > { %1308 = vmatprep.mubr.bf16.mxu0 %v1398_v20 }
  0x3e   : > { %1309 = vmatmul.mubr.bf16.gmra.mrb[12].mxu0 %v1399_v21 }
  0x3f   : > { %1312 = vmatprep.mubr.bf16.mxu0 %v1400_v22 }
  0x46   : > { %1313 = vmatmul.mubr.bf16.gmra.mrb[16].mxu0 %v1401_v23 }
  0x47   : > { %1316 = vmatprep.mubr.bf16.mxu0 %v1402_v24 }
  0x4e   : > { %1317 = vmatmul.mubr.bf16.gmra.mrb[20].mxu0 %v1403_v25 }
  0x4f   : > { %1320 = vmatprep.mubr.bf16.mxu0 %v1404_v26 }
  0x56   : > { %1321 = vmatmul.mubr.bf16.gmra.mrb[24].mxu0 %v1405_v27 }
  0x57   : > { %1324 = vmatprep.mubr.bf16.mxu0 %v1406_v28 }
  0x5e   : > { %1325 = vmatmul.mubr.bf16.gmra.mrb[28].mxu0 %v1407_v29 }
  0xf9   : > { %v1298_v32 = vpop.f32.mrb[0].mxu0 }
  0xfa   : > { %v533_v34 = vpop.f32.mrb[1].mxu0  ;;  %v542_v36 = vadd.f32 %v1298_v32, %v1550_v33 }
  0xfb   : > { %v1299_v35 = vpop.f32.mrb[2].mxu0  ;;  %v534_v39 = vadd.f32 %v1550_v33, %v533_v34 }
  0xfc   : > { %v545_v37 = vadd.f32 %v1299_v35, %v1550_v33  ;;  %v536_v38 = vpop.f32.mrb[3].mxu0 }
  0xfd   : > { %v537_v40 = vadd.f32 %v1550_v33, %v536_v38 }
  0xfe   : > { %v661_v41 = vpack.c.bf16 %v545_v37, %v542_v36 }
  0xff   : > { %v660_v42 = vpack.c.bf16 %v537_v40, %v534_v39 }
 0x101   : > { %v1302_v43 = vpop.f32.mrb[4].mxu0  ;;  %1344 = vmatprep.mubr.bf16.mxu1 %v660_v42 }
 0x102   : > { %v549_v44 = vpop.f32.mrb[5].mxu0  ;;  %1345 = vmatmul.mubr.bf16.vlgmr.msra.gmra.mrb[0].mxu1 %v661_v41  ;;  %v558_v46 = vadd.f32 %v1302_v43, %v1550_v33 }
 0x103   : > { %v1303_v45 = vpop.f32.mrb[6].mxu0  ;;  %v550_v49 = vadd.f32 %v1550_v33, %v549_v44 }
 0x104   : > { %v561_v47 = vadd.f32 %v1303_v45, %v1550_v33  ;;  %v552_v48 = vpop.f32.mrb[7].mxu0 }
 0x105   : > { %v553_v50 = vadd.f32 %v1550_v33, %v552_v48 }
 0x106   : > { %v663_v51 = vpack.c.bf16 %v561_v47, %v558_v46 }
 0x107   : > { %v662_v52 = vpack.c.bf16 %v553_v50, %v550_v49  ;;  %v1588_v50 = vld [vmem:[%s1825_s4] ss:$0 sm:$0xff] }
 0x109   : > { %v1306_v53 = vpop.f32.mrb[8].mxu0  ;;  %1348 = vmatprep.mubr.bf16.mxu1 %v662_v52 }
 0x10a   : > { %v565_v54 = vpop.f32.mrb[9].mxu0  ;;  %1349 = vmatmul.mubr.bf16.gmra.mrb[4].mxu1 %v663_v51  ;;  %v574_v56 = vadd.f32 %v1306_v53, %v1550_v33 }
 0x10b   : > { %v1307_v55 = vpop.f32.mrb[10].mxu0  ;;  %v566_v59 = vadd.f32 %v1550_v33, %v565_v54 }
 0x10c   : > { %v577_v57 = vadd.f32 %v1307_v55, %v1550_v33  ;;  %v568_v58 = vpop.f32.mrb[11].mxu0 }
 0x10d   : > { %v569_v60 = vadd.f32 %v1550_v33, %v568_v58 }
 0x10e   : > { %v665_v61 = vpack.c.bf16 %v577_v57, %v574_v56 }
 0x10f   : > { %v664_v62 = vpack.c.bf16 %v569_v60, %v566_v59 }
 0x111   : > { %v1310_v63 = vpop.f32.mrb[12].mxu0  ;;  %1352 = vmatprep.mubr.bf16.mxu1 %v664_v62 }
 0x112   : > { %v581_v0 = vpop.f32.mrb[13].mxu0  ;;  %1353 = vmatmul.mubr.bf16.gmra.mrb[8].mxu1 %v665_v61  ;;  %v590_v2 = vadd.f32 %v1310_v63, %v1550_v33 }
 0x113   : > { %v1311_v1 = vpop.f32.mrb[14].mxu0  ;;  %v582_v5 = vadd.f32 %v1550_v33, %v581_v0 }
 0x114   : > { %v593_v3 = vadd.f32 %v1311_v1, %v1550_v33  ;;  %v584_v4 = vpop.f32.mrb[15].mxu0 }
 0x115   : > { %v585_v6 = vadd.f32 %v1550_v33, %v584_v4 }
 0x116   : > { %v667_v7 = vpack.c.bf16 %v593_v3, %v590_v2 }
 0x117   : > { %v666_v8 = vpack.c.bf16 %v585_v6, %v582_v5 }
 0x119   : > { %v1314_v9 = vpop.f32.mrb[16].mxu0  ;;  %1356 = vmatprep.mubr.bf16.mxu1 %v666_v8 }
 0x11a   : > { %v597_v10 = vpop.f32.mrb[17].mxu0  ;;  %1357 = vmatmul.mubr.bf16.gmra.mrb[12].mxu1 %v667_v7  ;;  %v606_v12 = vadd.f32 %v1314_v9, %v1550_v33 }
 0x11b   : > { %v1315_v11 = vpop.f32.mrb[18].mxu0  ;;  %v598_v15 = vadd.f32 %v1550_v33, %v597_v10 }
 0x11c   : > { %v609_v13 = vadd.f32 %v1315_v11, %v1550_v33  ;;  %v600_v14 = vpop.f32.mrb[19].mxu0 }
 0x11d   : > { %v601_v16 = vadd.f32 %v1550_v33, %v600_v14 }
 0x11e   : > { %v669_v17 = vpack.c.bf16 %v609_v13, %v606_v12 }
 0x11f   : > { %v668_v18 = vpack.c.bf16 %v601_v16, %v598_v15 }
 0x121   : > { %v1318_v19 = vpop.f32.mrb[20].mxu0  ;;  %1360 = vmatprep.mubr.bf16.mxu1 %v668_v18 }
 0x122   : > { %v613_v20 = vpop.f32.mrb[21].mxu0  ;;  %1361 = vmatmul.mubr.bf16.gmra.mrb[16].mxu1 %v669_v17  ;;  %v622_v22 = vadd.f32 %v1318_v19, %v1550_v33 }
 0x123   : > { %v1319_v21 = vpop.f32.mrb[22].mxu0  ;;  %v614_v25 = vadd.f32 %v1550_v33, %v613_v20 }
 0x124   : > { %v625_v23 = vadd.f32 %v1319_v21, %v1550_v33  ;;  %v616_v24 = vpop.f32.mrb[23].mxu0 }
 0x125   : > { %v617_v26 = vadd.f32 %v1550_v33, %v616_v24 }
 0x126   : > { %v671_v27 = vpack.c.bf16 %v625_v23, %v622_v22 }
 0x127   : > { %v670_v28 = vpack.c.bf16 %v617_v26, %v614_v25 }
 0x129   : > { %v1322_v29 = vpop.f32.mrb[24].mxu0  ;;  %1364 = vmatprep.mubr.bf16.mxu1 %v670_v28 }
 0x12a   : > { %v629_v30 = vpop.f32.mrb[25].mxu0  ;;  %1365 = vmatmul.mubr.bf16.gmra.mrb[20].mxu1 %v671_v27  ;;  %v638_v32 = vadd.f32 %v1322_v29, %v1550_v33 }
 0x12b   : > { %v1323_v31 = vpop.f32.mrb[26].mxu0  ;;  %v630_v36 = vadd.f32 %v1550_v33, %v629_v30 }
 0x12c   : > { %v641_v34 = vadd.f32 %v1323_v31, %v1550_v33  ;;  %v632_v35 = vpop.f32.mrb[27].mxu0 }
 0x12d   : > { %v633_v37 = vadd.f32 %v1550_v33, %v632_v35 }
 0x12e   : > { %v673_v38 = vpack.c.bf16 %v641_v34, %v638_v32 }
 0x12f   : > { %v672_v39 = vpack.c.bf16 %v633_v37, %v630_v36 }
 0x131   : > { %v1326_v40 = vpop.f32.mrb[28].mxu0  ;;  %1368 = vmatprep.mubr.bf16.mxu1 %v672_v39 }
 0x132   : > { %v645_v41 = vpop.f32.mrb[29].mxu0  ;;  %1369 = vmatmul.mubr.bf16.gmra.mrb[24].mxu1 %v673_v38  ;;  %v654_v43 = vadd.f32 %v1326_v40, %v1550_v33 }
 0x133   : > { %v1327_v42 = vpop.f32.mrb[30].mxu0  ;;  %v646_v46 = vadd.f32 %v1550_v33, %v645_v41 }
 0x134   : > { %v657_v44 = vadd.f32 %v1327_v42, %v1550_v33  ;;  %v648_v45 = vpop.f32.mrb[31].mxu0 }
 0x135   : > { %v649_v47 = vadd.f32 %v1550_v33, %v648_v45 }
 0x136   : > { %v675_v48 = vpack.c.bf16 %v657_v44, %v654_v43 }
 0x137   : > { %v674_v49 = vpack.c.bf16 %v649_v47, %v646_v46 }
 0x139   : > { %1372 = vmatprep.mubr.bf16.mxu1 %v674_v49 }
 0x13a   : > { %1373 = vmatmul.mubr.bf16.gmra.mrb[28].mxu1 %v675_v48 }
 0x1d5   : > { %v1346_v33 = vpop.f32.mrb[0].mxu1 }
 0x1d6   : > { %v1596_v51 = vadd.f32 %v1346_v33, %v1588_v50  ;;  %v781_v52 = vpop.f32.mrb[1].mxu1 }
 0x1d7   : > { %v1599_v53 = vadd.f32 %v1588_v50, %v781_v52  ;;  %v1347_v54 = vpop.f32.mrb[2].mxu1 }
 0x1d8   : > { %910 = vst [vmem:[%s1593_s30 + $0x10] sm:$0xff] %v1596_v51  ;;  %v1604_v55 = vadd.f32 %v1347_v54, %v1588_v50  ;;  %v784_v56 = vpop.f32.mrb[3].mxu1 }
 0x1d9   : > { %908 = vst [vmem:[%s1593_s30] sm:$0xff] %v1599_v53  ;;  %v1609_v57 = vadd.f32 %v1588_v50, %v784_v56 }
 0x1da   : > { %911 = vst [vmem:[%s1593_s30 + $0x18] sm:$0xff] %v1604_v55 }
 0x1db   : > { %909 = vst [vmem:[%s1593_s30 + $0x8] sm:$0xff] %v1609_v57  ;;  %v940_v58 = vadd.f32 %v1609_v57, %v1599_v53 }
 0x1dd   : > { %v941_v59 = vadd.f32 %v940_v58, %v1596_v51  ;;  %v1350_v60 = vpop.f32.mrb[4].mxu1 }
 0x1de   : > { %v1619_v61 = vadd.f32 %v1350_v60, %v1588_v50  ;;  %v797_v62 = vpop.f32.mrb[5].mxu1 }
 0x1df   : > { %v1622_v63 = vadd.f32 %v1588_v50, %v797_v62  ;;  %v942_v0 = vadd.f32 %v941_v59, %v1604_v55  ;;  %v1351_v1 = vpop.f32.mrb[6].mxu1 }
 0x1e0   : > { %914 = vst [vmem:[%s1593_s30 + $0x30] sm:$0xff] %v1619_v61  ;;  %v1628_v2 = vadd.f32 %v1351_v1, %v1588_v50  ;;  %v800_v3 = vpop.f32.mrb[7].mxu1 }
 0x1e1   : > { %912 = vst [vmem:[%s1593_s30 + $0x20] sm:$0xff] %v1622_v63  ;;  %v943_v4 = vadd.f32 %v942_v0, %v1622_v63  ;;  %v1634_v5 = vadd.f32 %v1588_v50, %v800_v3 }
 0x1e2   : > { %915 = vst [vmem:[%s1593_s30 + $0x38] sm:$0xff] %v1628_v2 }
 0x1e3   : > { %913 = vst [vmem:[%s1593_s30 + $0x28] sm:$0xff] %v1634_v5  ;;  %v944_v6 = vadd.f32 %v943_v4, %v1634_v5 }
 0x1e5   : > { %v945_v7 = vadd.f32 %v944_v6, %v1619_v61  ;;  %v1354_v8 = vpop.f32.mrb[8].mxu1 }
 0x1e6   : > { %v1643_v9 = vadd.f32 %v1354_v8, %v1588_v50  ;;  %v813_v10 = vpop.f32.mrb[9].mxu1 }
 0x1e7   : > { %v1646_v11 = vadd.f32 %v1588_v50, %v813_v10  ;;  %v946_v12 = vadd.f32 %v945_v7, %v1628_v2  ;;  %v1355_v13 = vpop.f32.mrb[10].mxu1 }
 0x1e8   : > { %918 = vst [vmem:[%s1593_s30 + $0x50] sm:$0xff] %v1643_v9  ;;  %v1652_v14 = vadd.f32 %v1355_v13, %v1588_v50  ;;  %v816_v15 = vpop.f32.mrb[11].mxu1 }
 0x1e9   : > { %916 = vst [vmem:[%s1593_s30 + $0x40] sm:$0xff] %v1646_v11  ;;  %v947_v16 = vadd.f32 %v946_v12, %v1646_v11  ;;  %v1658_v17 = vadd.f32 %v1588_v50, %v816_v15 }
 0x1ea   : > { %919 = vst [vmem:[%s1593_s30 + $0x58] sm:$0xff] %v1652_v14 }
 0x1eb   : > { %917 = vst [vmem:[%s1593_s30 + $0x48] sm:$0xff] %v1658_v17  ;;  %v948_v18 = vadd.f32 %v947_v16, %v1658_v17 }
 0x1ed   : > { %v949_v19 = vadd.f32 %v948_v18, %v1643_v9  ;;  %v1358_v20 = vpop.f32.mrb[12].mxu1 }
 0x1ee   : > { %v1667_v21 = vadd.f32 %v1358_v20, %v1588_v50  ;;  %v829_v22 = vpop.f32.mrb[13].mxu1 }
 0x1ef   : > { %v1670_v23 = vadd.f32 %v1588_v50, %v829_v22  ;;  %v950_v24 = vadd.f32 %v949_v19, %v1652_v14  ;;  %v1359_v25 = vpop.f32.mrb[14].mxu1 }
 0x1f0   : > { %922 = vst [vmem:[%s1593_s30 + $0x70] sm:$0xff] %v1667_v21  ;;  %v1676_v26 = vadd.f32 %v1359_v25, %v1588_v50  ;;  %v832_v27 = vpop.f32.mrb[15].mxu1 }
 0x1f1   : > { %920 = vst [vmem:[%s1593_s30 + $0x60] sm:$0xff] %v1670_v23  ;;  %v951_v28 = vadd.f32 %v950_v24, %v1670_v23  ;;  %v1682_v29 = vadd.f32 %v1588_v50, %v832_v27 }
 0x1f2   : > { %923 = vst [vmem:[%s1593_s30 + $0x78] sm:$0xff] %v1676_v26 }
 0x1f3   : > { %921 = vst [vmem:[%s1593_s30 + $0x68] sm:$0xff] %v1682_v29  ;;  %v952_v30 = vadd.f32 %v951_v28, %v1682_v29 }
 0x1f5   : > { %v953_v31 = vadd.f32 %v952_v30, %v1667_v21  ;;  %v1362_v32 = vpop.f32.mrb[16].mxu1 }
 0x1f6   : > { %v1691_v34 = vadd.f32 %v1362_v32, %v1588_v50  ;;  %v845_v35 = vpop.f32.mrb[17].mxu1 }
 0x1f7   : > { %v1694_v36 = vadd.f32 %v1588_v50, %v845_v35  ;;  %v954_v37 = vadd.f32 %v953_v31, %v1676_v26  ;;  %v1363_v38 = vpop.f32.mrb[18].mxu1 }
 0x1f8   : > { %926 = vst [vmem:[%s1593_s30 + $0x90] sm:$0xff] %v1691_v34  ;;  %v1700_v39 = vadd.f32 %v1363_v38, %v1588_v50  ;;  %v848_v40 = vpop.f32.mrb[19].mxu1 }
 0x1f9   : > { %924 = vst [vmem:[%s1593_s30 + $0x80] sm:$0xff] %v1694_v36  ;;  %v955_v41 = vadd.f32 %v954_v37, %v1694_v36  ;;  %v1706_v42 = vadd.f32 %v1588_v50, %v848_v40 }
 0x1fa   : > { %927 = vst [vmem:[%s1593_s30 + $0x98] sm:$0xff] %v1700_v39 }
 0x1fb   : > { %925 = vst [vmem:[%s1593_s30 + $0x88] sm:$0xff] %v1706_v42  ;;  %v956_v43 = vadd.f32 %v955_v41, %v1706_v42 }
 0x1fd   : > { %v957_v44 = vadd.f32 %v956_v43, %v1691_v34  ;;  %v1366_v45 = vpop.f32.mrb[20].mxu1 }
 0x1fe   : > { %v1715_v46 = vadd.f32 %v1366_v45, %v1588_v50  ;;  %v861_v47 = vpop.f32.mrb[21].mxu1 }
 0x1ff   : > { %v1718_v48 = vadd.f32 %v1588_v50, %v861_v47  ;;  %v958_v49 = vadd.f32 %v957_v44, %v1700_v39  ;;  %v1367_v33 = vpop.f32.mrb[22].mxu1 }
 0x200   : > { %930 = vst [vmem:[%s1593_s30 + $0xb0] sm:$0xff] %v1715_v46  ;;  %v1724_v52 = vadd.f32 %v1367_v33, %v1588_v50  ;;  %v864_v54 = vpop.f32.mrb[23].mxu1 }
 0x201   : > { %928 = vst [vmem:[%s1593_s30 + $0xa0] sm:$0xff] %v1718_v48  ;;  %v959_v56 = vadd.f32 %v958_v49, %v1718_v48  ;;  %v865_v58 = vadd.f32 %v1588_v50, %v864_v54 }
 0x202   : > { %931 = vst [vmem:[%s1593_s30 + $0xb8] sm:$0xff] %v1724_v52 }
 0x203   : > { %929 = vst [vmem:[%s1593_s30 + $0xa8] sm:$0xff] %v865_v58  ;;  %v960_v59 = vadd.f32 %v959_v56, %v865_v58 }
 0x205   : > { %v961_v60 = vadd.f32 %v960_v59, %v1715_v46  ;;  %v1370_v62 = vpop.f32.mrb[24].mxu1 }
 0x206   : > { %v886_v0 = vadd.f32 %v1370_v62, %v1588_v50  ;;  %v877_v1 = vpop.f32.mrb[25].mxu1 }
 0x207   : > { %v878_v3 = vadd.f32 %v1588_v50, %v877_v1  ;;  %v962_v4 = vadd.f32 %v961_v60, %v1724_v52  ;;  %v1371_v6 = vpop.f32.mrb[26].mxu1 }
 0x208   : > { %934 = vst [vmem:[%s1593_s30 + $0xd0] sm:$0xff] %v886_v0  ;;  %v889_v7 = vadd.f32 %v1371_v6, %v1588_v50  ;;  %v880_v8 = vpop.f32.mrb[27].mxu1 }
 0x209   : > { %932 = vst [vmem:[%s1593_s30 + $0xc0] sm:$0xff] %v878_v3  ;;  %v963_v10 = vadd.f32 %v962_v4, %v878_v3  ;;  %v881_v12 = vadd.f32 %v1588_v50, %v880_v8 }
 0x20a   : > { %935 = vst [vmem:[%s1593_s30 + $0xd8] sm:$0xff] %v889_v7 }
 0x20b   : > { %933 = vst [vmem:[%s1593_s30 + $0xc8] sm:$0xff] %v881_v12  ;;  %v964_v13 = vadd.f32 %v963_v10, %v881_v12 }
 0x20d   : > { %v965_v15 = vadd.f32 %v964_v13, %v886_v0  ;;  %v1374_v16 = vpop.f32.mrb[28].mxu1 }
 0x20e   : > { %v902_v18 = vadd.f32 %v1374_v16, %v1588_v50  ;;  %v893_v19 = vpop.f32.mrb[29].mxu1 }
 0x20f   : > { %v894_v20 = vadd.f32 %v1588_v50, %v893_v19  ;;  %v966_v22 = vadd.f32 %v965_v15, %v889_v7  ;;  %v1375_v24 = vpop.f32.mrb[30].mxu1 }
 0x210   : > { %938 = vst [vmem:[%s1593_s30 + $0xf0] sm:$0xff] %v902_v18  ;;  %v905_v25 = vadd.f32 %v1375_v24, %v1588_v50  ;;  %v896_v27 = vpop.f32.mrb[31].mxu1 }
 0x211   : > { %936 = vst [vmem:[%s1593_s30 + $0xe0] sm:$0xff] %v894_v20  ;;  %v967_v28 = vadd.f32 %v966_v22, %v894_v20  ;;  %v897_v30 = vadd.f32 %v1588_v50, %v896_v27 }
 0x212   : > { %939 = vst [vmem:[%s1593_s30 + $0xf8] sm:$0xff] %v905_v25 }
 0x213   : > { %937 = vst [vmem:[%s1593_s30 + $0xe8] sm:$0xff] %v897_v30  ;;  %v968_v31 = vadd.f32 %v967_v28, %v897_v30 }
 0x215   : > { %v969_v32 = vadd.f32 %v968_v31, %v902_v18 }
 0x217   : > { %v970_v35 = vadd.f32 %v969_v32, %v905_v25 }
 0x219   : > { %v971_v37 = vrot.slane %v970_v35, 4 }
 0x21b   : > { %v972_v38 = vadd.f32 %v971_v37, %v970_v35 }
 0x21d   : > { %v973_v40 = vrot.slane %v972_v38, 2 }
 0x21f   : > { %v974_v41 = vadd.f32 %v973_v40, %v972_v38 }
 0x221   : > { %v975_v43 = vrot.slane %v974_v41, 1 }
 0x223   : > { %v976_v44 = vadd.f32 %v975_v43, %v974_v41 }
 0x225   : > { %v977_v50 = vmul.f32 0.00390625, %v976_v44 }
 0x227   : > { %1079 = vst [vmem:[%s295_s9] sm:$0x1] %v977_v50  ;;  %v986_v45 = vsub.f32 %v1646_v11, %v977_v50  ;;  %v987_v47 = vsub.f32 %v1658_v17, %v977_v50  ;;  %v989_v49 = vsub.f32 %v1652_v14, %v977_v50  ;;  %v990_v33 = vsub.f32 %v1670_v23, %v977_v50 }
 0x228   : > { %v991_v54 = vsub.f32 %v1682_v29, %v977_v50  ;;  %v992_v56 = vsub.f32 %v1667_v21, %v977_v50  ;;  %v993_v59 = vsub.f32 %v1676_v26, %v977_v50  ;;  %v994_v60 = vsub.f32 %v1694_v36, %v977_v50 }
 0x229   : > { %v995_v62 = vsub.f32 %v1706_v42, %v977_v50  ;;  %v996_v1 = vsub.f32 %v1691_v34, %v977_v50  ;;  %v997_v11 = vsub.f32 %v1700_v39, %v977_v50  ;;  %v998_v17 = vsub.f32 %v1718_v48, %v977_v50 }
 0x22a   : > { %v999_v4 = vsub.f32 %v865_v58, %v977_v50  ;;  %v1000_v14 = vsub.f32 %v1715_v46, %v977_v50  ;;  %v1001_v23 = vsub.f32 %v1724_v52, %v977_v50  ;;  %v1773_v29 = vsub.f32 %v878_v3, %v977_v50 }
 0x22b   : > { %v1775_v21 = vsub.f32 %v881_v12, %v977_v50  ;;  %v1777_v26 = vsub.f32 %v886_v0, %v977_v50  ;;  %v1779_v36 = vsub.f32 %v889_v7, %v977_v50  ;;  %v1781_v42 = vsub.f32 %v894_v20, %v977_v50 }
 0x22c   : > { %v1783_v34 = vsub.f32 %v897_v30, %v977_v50  ;;  %v1785_v39 = vsub.f32 %v902_v18, %v977_v50  ;;  %v1787_v48 = vsub.f32 %v905_v25, %v977_v50  ;;  %v978_v46 = vsub.f32 %v1599_v53, %v977_v50 }
 0x22d   : > { %v979_v52 = vsub.f32 %v1609_v57, %v977_v50  ;;  %v980_v58 = vsub.f32 %v1596_v51, %v977_v50  ;;  %v981_v0 = vsub.f32 %v1604_v55, %v977_v50  ;;  %v982_v7 = vsub.f32 %v1622_v63, %v977_v50 }
 0x22e   : > { %v1010_v3 = vmul.f32 %v978_v46, %v978_v46  ;;  %v983_v12 = vsub.f32 %v1634_v5, %v977_v50  ;;  %v984_v16 = vsub.f32 %v1619_v61, %v977_v50  ;;  %v985_v57 = vsub.f32 %v1628_v2, %v977_v50 }
 0x22f   : > { %v1011_v6 = vmul.f32 %v979_v52, %v979_v52  ;;  %v1012_v8 = vmul.f32 %v980_v58, %v980_v58  ;;  %v1013_v13 = vmul.f32 %v981_v0, %v981_v0  ;;  %v1014_v18 = vmul.f32 %v982_v7, %v982_v7 }
 0x230   : > { %v1015_v19 = vmul.f32 %v983_v12, %v983_v12  ;;  %v1016_v20 = vmul.f32 %v984_v16, %v984_v16  ;;  %v1017_v24 = vmul.f32 %v985_v57, %v985_v57  ;;  %v988_v63 = vsub.f32 %v1643_v9, %v977_v50 }
 0x231   : > { %v1042_v10 = vadd.f32 %v1011_v6, %v1010_v3  ;;  %v1018_v25 = vmul.f32 %v986_v45, %v986_v45  ;;  %v1019_v28 = vmul.f32 %v987_v47, %v987_v47  ;;  %v1021_v32 = vmul.f32 %v989_v49, %v989_v49 }
 0x232   : > { %v1020_v30 = vmul.f32 %v988_v63, %v988_v63  ;;  %v1022_v35 = vmul.f32 %v990_v33, %v990_v33  ;;  %v1023_v38 = vmul.f32 %v991_v54, %v991_v54  ;;  %v1024_v40 = vmul.f32 %v992_v56, %v992_v56 }
 0x233   : > { %v1043_v15 = vadd.f32 %v1042_v10, %v1012_v8  ;;  %v1025_v43 = vmul.f32 %v993_v59, %v993_v59  ;;  %v1026_v46 = vmul.f32 %v994_v60, %v994_v60  ;;  %v1027_v58 = vmul.f32 %v995_v62, %v995_v62 }
 0x234   : > { %v1028_v50 = vmul.f32 %v996_v1, %v996_v1  ;;  %v1029_v47 = vmul.f32 %v997_v11, %v997_v11  ;;  %v1030_v6 = vmul.f32 %v998_v17, %v998_v17  ;;  %v1031_v49 = vmul.f32 %v999_v4, %v999_v4 }
 0x235   : > { %v1044_v53 = vadd.f32 %v1043_v15, %v1013_v13  ;;  %v1032_v33 = vmul.f32 %v1000_v14, %v1000_v14  ;;  %v1033_v54 = vmul.f32 %v1001_v23, %v1001_v23  ;;  %v1034_v56 = vmul.f32 %v1773_v29, %v1773_v29 }
 0x236   : > { %v1035_v60 = vmul.f32 %v1775_v21, %v1775_v21  ;;  %v1036_v1 = vmul.f32 %v1777_v26, %v1777_v26  ;;  %v1037_v17 = vmul.f32 %v1779_v36, %v1779_v36  ;;  %v1038_v14 = vmul.f32 %v1781_v42, %v1781_v42 }
 0x237   : > { %v1045_v51 = vadd.f32 %v1044_v53, %v1014_v18  ;;  %v1039_v29 = vmul.f32 %v1783_v34, %v1783_v34  ;;  %v1040_v21 = vmul.f32 %v1785_v39, %v1785_v39  ;;  %v1041_v26 = vmul.f32 %v1787_v48, %v1787_v48 }
 0x239   : > { %v1046_v22 = vadd.f32 %v1045_v51, %v1015_v19 }
 0x23b   : > { %v1047_v55 = vadd.f32 %v1046_v22, %v1016_v20 }
 0x23d   : > { %v1048_v27 = vadd.f32 %v1047_v55, %v1017_v24 }
 0x23f   : > { %v1049_v5 = vadd.f32 %v1048_v27, %v1018_v25 }
 0x241   : > { %v1050_v31 = vadd.f32 %v1049_v5, %v1019_v28 }
 0x243   : > { %v1051_v61 = vadd.f32 %v1050_v31, %v1020_v30 }
 0x245   : > { %v1052_v37 = vadd.f32 %v1051_v61, %v1021_v32 }
 0x247   : > { %v1053_v2 = vadd.f32 %v1052_v37, %v1022_v35 }
 0x249   : > { %v1054_v41 = vadd.f32 %v1053_v2, %v1023_v38 }
 0x24b   : > { %v1055_v44 = vadd.f32 %v1054_v41, %v1024_v40 }
 0x24d   : > { %v1056_v52 = vadd.f32 %v1055_v44, %v1025_v43 }
 0x24f   : > { %v1057_v9 = vadd.f32 %v1056_v52, %v1026_v46 }
 0x251   : > { %v1058_v45 = vadd.f32 %v1057_v9, %v1027_v58 }
 0x253   : > { %v1059_v3 = vadd.f32 %v1058_v45, %v1028_v50 }
 0x255   : > { %v1060_v0 = vadd.f32 %v1059_v3, %v1029_v47 }
 0x257   : > { %v1061_v7 = vadd.f32 %v1060_v0, %v1030_v6 }
 0x259   : > { %v1062_v8 = vadd.f32 %v1061_v7, %v1031_v49 }
 0x25b   : > { %v1063_v10 = vadd.f32 %v1062_v8, %v1032_v33 }
 0x25d   : > { %v1064_v59 = vadd.f32 %v1063_v10, %v1033_v54 }
 0x25f   : > { %v1065_v62 = vadd.f32 %v1064_v59, %v1034_v56 }
 0x261   : > { %v1066_v11 = vadd.f32 %v1065_v62, %v1035_v60 }
 0x263   : > { %v1067_v4 = vadd.f32 %v1066_v11, %v1036_v1 }
 0x265   : > { %v1068_v23 = vadd.f32 %v1067_v4, %v1037_v17 }
 0x267   : > { %v1069_v12 = vadd.f32 %v1068_v23, %v1038_v14 }
 0x269   : > { %v1070_v13 = vadd.f32 %v1069_v12, %v1039_v29 }
 0x26b   : > { %v1071_v15 = vadd.f32 %v1070_v13, %v1040_v21 }
 0x26d   : > { %v1072_v16 = vadd.f32 %v1071_v15, %v1041_v26 }
 0x26f   : > { %v1073_v36 = vrot.slane %v1072_v16, 4 }
 0x271   : > { %v1074_v18 = vadd.f32 %v1073_v36, %v1072_v16 }
 0x273   : > { %v1075_v53 = vrot.slane %v1074_v18, 2 }
 0x275   : > { %v1076_v57 = vadd.f32 %v1075_v53, %v1074_v18 }
 0x277   : > { %v1077_v19 = vrot.slane %v1076_v57, 1 }
 0x279   : > { %v1078_v42 = vadd.f32 %v1077_v19, %v1076_v57 }
 0x27b   : > { %1080 = vst [vmem:[%s298_s12] sm:$0x1] %v1078_v42 }
 0x27c PF: > { %s18_s24 = sadd.s32 1, %s1422_s24  }
 0x27d   : > { %p15_p5 = scmp.ge.s32.totalorder %s18_s24, 4  }
 0x27f   :  { %17 = sbr.rel (!%p15_p5) target bundleno = 1 (0x1), region = 94 }

// kernel: conv_block_forward.7
= control target key start
LH: loop header
LB: loop body
LE: loop exit
PB: predicated region body
PF: predicated region fallthrough
CT: control target
= control target key end

     0   :  { %s512_s0 = inlined_call_operand.vmem [shape: f32[128,128], index: 0, kind: input, shape index: {}]   ;;  %s513_s1 = inlined_call_operand.vmem [shape: f32[1,128], index: 1, kind: input, shape index: {}]   ;;  %s514_s2 = inlined_call_operand.vmem [shape: f32[1,128], index: 2, kind: input, shape index: {}]   ;;  %s515_s3 = inlined_call_operand.vmem [shape: f32[128,128], index: 3, kind: output, shape index: {}]  }
   0x1   :  { %v14_v0 = vld [vmem:[%s512_s0] sm:$0xff]  ;;  %v15_v4 = vld [vmem:[%s512_s0 + $0x8] sm:$0xff]  ;;  %v16_v5 = vld [vmem:[%s512_s0 + $0x10] sm:$0xff] }
   0x2   :  { %v316_v1 = vld [vmem:[%s513_s1] ss:$0 sm:$0xff]  ;;  %v17_v6 = vld [vmem:[%s512_s0 + $0x18] sm:$0xff]  ;;  %v19_v11 = vld [vmem:[%s512_s0 + $0x28] sm:$0xff] }
   0x3   :  { %v321_v2 = vld [vmem:[%s514_s2] ss:$0 sm:$0xff]  ;;  %v37_v3 = vmul.f32 %v316_v1, %v14_v0  ;;  %v38_v7 = vmul.f32 %v316_v1, %v15_v4  ;;  %v39_v8 = vmul.f32 %v316_v1, %v16_v5  ;;  %v40_v9 = vmul.f32 %v316_v1, %v17_v6  ;;  %v20_v12 = vld [vmem:[%s512_s0 + $0x30] sm:$0xff]  ;;  %v21_v17 = vld [vmem:[%s512_s0 + $0x38] sm:$0xff] }
   0x4   :  { %v18_v10 = vld [vmem:[%s512_s0 + $0x20] sm:$0xff]  ;;  %v42_v15 = vmul.f32 %v316_v1, %v19_v11  ;;  %v43_v16 = vmul.f32 %v316_v1, %v20_v12  ;;  %v44_v21 = vmul.f32 %v316_v1, %v21_v17  ;;  %v23_v23 = vld [vmem:[%s512_s0 + $0x48] sm:$0xff]  ;;  %v24_v28 = vld [vmem:[%s512_s0 + $0x50] sm:$0xff] }
   0x5   :  { %v346_v13 = vadd.f32 %v321_v2, %v37_v3  ;;  %v41_v14 = vmul.f32 %v316_v1, %v18_v10  ;;  %v355_v18 = vadd.f32 %v321_v2, %v38_v7  ;;  %v358_v19 = vadd.f32 %v321_v2, %v39_v8  ;;  %v22_v22 = vld [vmem:[%s512_s0 + $0x40] sm:$0xff]  ;;  %v25_v29 = vld [vmem:[%s512_s0 + $0x58] sm:$0xff]  ;;  %v27_v57 = vld [vmem:[%s512_s0 + $0x68] sm:$0xff] }
   0x6   :  { %v361_v20 = vadd.f32 %v321_v2, %v40_v9  ;;  %v375_v26 = vadd.f32 %v321_v2, %v42_v15  ;;  %v378_v27 = vadd.f32 %v321_v2, %v43_v16  ;;  %v26_v30 = vld [vmem:[%s512_s0 + $0x60] sm:$0xff]  ;;  %v393_v34 = vadd.f32 %v321_v2, %v44_v21  ;;  %v28_v60 = vld [vmem:[%s512_s0 + $0x70] sm:$0xff]  ;;  %v29_v63 = vld [vmem:[%s512_s0 + $0x78] sm:$0xff] }
   0x7   :  { %v210_v24 = vmul.f32 -1.442695, %v346_v13  ;;  %v372_v25 = vadd.f32 %v321_v2, %v41_v14  ;;  %v211_v31 = vmul.f32 -1.442695, %v355_v18  ;;  %v212_v32 = vmul.f32 -1.442695, %v358_v19 }
   0x8   :  { %v213_v33 = vmul.f32 -1.442695, %v361_v20  ;;  %v215_v36 = vmul.f32 -1.442695, %v375_v26  ;;  %v216_v37 = vmul.f32 -1.442695, %v378_v27  ;;  %v45_v38 = vmul.f32 %v316_v1, %v22_v22 }
   0x9   :  { %226 = vpow2.f32 %v210_v24  ;;  %v214_v35 = vmul.f32 -1.442695, %v372_v25  ;;  %v46_v39 = vmul.f32 %v316_v1, %v23_v23  ;;  %v47_v40 = vmul.f32 %v316_v1, %v24_v28 }
   0xa   :  { %228 = vpow2.f32 %v211_v31  ;;  %v48_v41 = vmul.f32 %v316_v1, %v25_v29  ;;  %v49_v42 = vmul.f32 %v316_v1, %v26_v30  ;;  %v217_v43 = vmul.f32 -1.442695, %v393_v34 }
   0xb   :  { %230 = vpow2.f32 %v212_v32  ;;  %v405_v44 = vadd.f32 %v321_v2, %v45_v38  ;;  %v408_v45 = vadd.f32 %v321_v2, %v46_v39  ;;  %v411_v46 = vadd.f32 %v321_v2, %v47_v40 }
   0xc   :  { %232 = vpow2.f32 %v213_v33  ;;  %v414_v47 = vadd.f32 %v321_v2, %v48_v41  ;;  %v417_v48 = vadd.f32 %v321_v2, %v49_v42  ;;  %v50_v4 = vmul.f32 %v316_v1, %v27_v57 }
   0xd   :  { %234 = vpow2.f32 %v214_v35  ;;  %v218_v49 = vmul.f32 -1.442695, %v405_v44  ;;  %v219_v50 = vmul.f32 -1.442695, %v408_v45  ;;  %v220_v51 = vmul.f32 -1.442695, %v411_v46 }
   0xe   :  { %236 = vpow2.f32 %v215_v36  ;;  %v221_v52 = vmul.f32 -1.442695, %v414_v47  ;;  %v222_v53 = vmul.f32 -1.442695, %v417_v48  ;;  %v51_v7 = vmul.f32 %v316_v1, %v28_v60 }
   0xf   :  { %238 = vpow2.f32 %v216_v37  ;;  %v52_v10 = vmul.f32 %v316_v1, %v29_v63  ;;  %v437_v16 = vadd.f32 %v321_v2, %v50_v4 }
  0x10   :  { %240 = vpow2.f32 %v217_v43  ;;  %v440_v22 = vadd.f32 %v321_v2, %v51_v7 }
  0x11   :  { %242 = vpow2.f32 %v218_v49  ;;  %v443_v1 = vadd.f32 %v321_v2, %v52_v10  ;;  %v223_v32 = vmul.f32 -1.442695, %v437_v16 }
  0x12   :  { %244 = vpow2.f32 %v219_v50  ;;  %v224_v36 = vmul.f32 -1.442695, %v440_v22 }
  0x13   :  { %v227_v54 = vpop.eup %226  ;;  %246 = vpow2.f32 %v220_v51  ;;  %v225_v2 = vmul.f32 -1.442695, %v443_v1 }
  0x14   :  { %v229_v55 = vpop.eup %228  ;;  %v124_v56 = vadd.f32 1.0, %v227_v54  ;;  %248 = vpow2.f32 %v221_v52 }
  0x15   :  { %v231_v58 = vpop.eup %230  ;;  %v125_v59 = vadd.f32 1.0, %v229_v55  ;;  %250 = vpow2.f32 %v222_v53 }
  0x16   :  { %v233_v61 = vpop.eup %232  ;;  %252 = vrcp.f32 %v124_v56  ;;  %v126_v62 = vadd.f32 1.0, %v231_v58 }
  0x17   :  { %v235_v0 = vpop.eup %234  ;;  %254 = vrcp.f32 %v125_v59  ;;  %v127_v3 = vadd.f32 1.0, %v233_v61 }
  0x18   :  { %v237_v5 = vpop.eup %236  ;;  %256 = vrcp.f32 %v126_v62  ;;  %v128_v6 = vadd.f32 1.0, %v235_v0 }
  0x19   :  { %v239_v8 = vpop.eup %238  ;;  %258 = vrcp.f32 %v127_v3  ;;  %v129_v9 = vadd.f32 1.0, %v237_v5 }
  0x1a   :  { %v241_v11 = vpop.eup %240  ;;  %260 = vrcp.f32 %v128_v6  ;;  %v130_v12 = vadd.f32 1.0, %v239_v8 }
  0x1b   :  { %v243_v14 = vpop.eup %242  ;;  %262 = vrcp.f32 %v129_v9  ;;  %v131_v15 = vadd.f32 1.0, %v241_v11 }
  0x1c   :  { %v245_v17 = vpop.eup %244  ;;  %264 = vrcp.f32 %v130_v12  ;;  %v132_v21 = vadd.f32 1.0, %v243_v14 }
  0x1d   :  { %v247_v23 = vpop.eup %246  ;;  %266 = vrcp.f32 %v131_v15  ;;  %v133_v24 = vadd.f32 1.0, %v245_v17 }
  0x1e   :  { %v249_v28 = vpop.eup %248  ;;  %268 = vrcp.f32 %v132_v21  ;;  %v134_v29 = vadd.f32 1.0, %v247_v23 }
  0x1f   :  { %v251_v30 = vpop.eup %250  ;;  %270 = vrcp.f32 %v133_v24  ;;  %v135_v31 = vadd.f32 1.0, %v249_v28 }
  0x20   :  { %v253_v33 = vpop.eup %252  ;;  %272 = vrcp.f32 %v134_v29  ;;  %v136_v35 = vadd.f32 1.0, %v251_v30 }
  0x21   :  { %v255_v37 = vpop.eup %254  ;;  %v172_v38 = vmul.f32 %v253_v33, %v346_v13  ;;  %274 = vrcp.f32 %v135_v31 }
  0x22   :  { %v257_v39 = vpop.eup %256  ;;  %v173_v40 = vmul.f32 %v255_v37, %v355_v18  ;;  %276 = vrcp.f32 %v136_v35 }
  0x23   :  { %v259_v41 = vpop.eup %258  ;;  %188 = vst [vmem:[%s515_s3] sm:$0xff] %v172_v38  ;;  %v174_v42 = vmul.f32 %v257_v39, %v358_v19  ;;  %278 = vpow2.f32 %v223_v32 }
  0x24   :  { %v261_v43 = vpop.eup %260  ;;  %189 = vst [vmem:[%s515_s3 + $0x8] sm:$0xff] %v173_v40  ;;  %v175_v13 = vmul.f32 %v259_v41, %v361_v20  ;;  %280 = vpow2.f32 %v224_v36 }
  0x25   :  { %v263_v49 = vpop.eup %262  ;;  %190 = vst [vmem:[%s515_s3 + $0x10] sm:$0xff] %v174_v42  ;;  %v176_v18 = vmul.f32 %v261_v43, %v372_v25  ;;  %282 = vpow2.f32 %v225_v2 }
  0x26   :  { %v265_v50 = vpop.eup %264  ;;  %191 = vst [vmem:[%s515_s3 + $0x18] sm:$0xff] %v175_v13  ;;  %v177_v19 = vmul.f32 %v263_v49, %v375_v26 }
  0x27   :  { %v267_v51 = vpop.eup %266  ;;  %192 = vst [vmem:[%s515_s3 + $0x20] sm:$0xff] %v176_v18  ;;  %v178_v20 = vmul.f32 %v265_v50, %v378_v27 }
  0x28   :  { %v269_v52 = vpop.eup %268  ;;  %193 = vst [vmem:[%s515_s3 + $0x28] sm:$0xff] %v177_v19  ;;  %v179_v25 = vmul.f32 %v267_v51, %v393_v34 }
  0x29   :  { %v271_v53 = vpop.eup %270  ;;  %194 = vst [vmem:[%s515_s3 + $0x30] sm:$0xff] %v178_v20  ;;  %v180_v26 = vmul.f32 %v269_v52, %v405_v44 }
  0x2a   :  { %v273_v54 = vpop.eup %272  ;;  %195 = vst [vmem:[%s515_s3 + $0x38] sm:$0xff] %v179_v25  ;;  %v181_v27 = vmul.f32 %v271_v53, %v408_v45 }
  0x2b   :  { %v275_v55 = vpop.eup %274  ;;  %196 = vst [vmem:[%s515_s3 + $0x40] sm:$0xff] %v180_v26  ;;  %v182_v34 = vmul.f32 %v273_v54, %v411_v46 }
  0x2c   :  { %v277_v56 = vpop.eup %276  ;;  %197 = vst [vmem:[%s515_s3 + $0x48] sm:$0xff] %v181_v27  ;;  %v183_v44 = vmul.f32 %v275_v55, %v414_v47 }
  0x2d   :  { %v279_v57 = vpop.eup %278  ;;  %198 = vst [vmem:[%s515_s3 + $0x50] sm:$0xff] %v182_v34  ;;  %v184_v45 = vmul.f32 %v277_v56, %v417_v48 }
  0x2e   :  { %v281_v58 = vpop.eup %280  ;;  %199 = vst [vmem:[%s515_s3 + $0x58] sm:$0xff] %v183_v44  ;;  %v137_v46 = vadd.f32 1.0, %v279_v57 }
  0x2f   :  { %v283_v59 = vpop.eup %282  ;;  %200 = vst [vmem:[%s515_s3 + $0x60] sm:$0xff] %v184_v45  ;;  %v138_v60 = vadd.f32 1.0, %v281_v58 }
  0x30   :  { %284 = vrcp.f32 %v137_v46  ;;  %v139_v47 = vadd.f32 1.0, %v283_v59 }
  0x31   :  { %286 = vrcp.f32 %v138_v60 }
  0x32   :  { %288 = vrcp.f32 %v139_v47 }
  0x3a   :  { %v285_v61 = vpop.eup %284 }
  0x3b   :  { %v287_v62 = vpop.eup %286  ;;  %v185_v48 = vmul.f32 %v285_v61, %v437_v16 }
  0x3c   :  { %v289_v63 = vpop.eup %288  ;;  %v186_v0 = vmul.f32 %v287_v62, %v440_v22 }
  0x3d   :  { %201 = vst [vmem:[%s515_s3 + $0x68] sm:$0xff] %v185_v48  ;;  %v187_v3 = vmul.f32 %v289_v63, %v443_v1 }
  0x3e   :  { %202 = vst [vmem:[%s515_s3 + $0x70] sm:$0xff] %v186_v0 }
  0x3f   :  { %203 = vst [vmem:[%s515_s3 + $0x78] sm:$0xff] %v187_v3 }

// kernel: conv_block_forward.6
= control target key start
LH: loop header
LB: loop body
LE: loop exit
PB: predicated region body
PF: predicated region fallthrough
CT: control target
= control target key end

     0   :  { %s617_s1 = inlined_call_operand.vmem [shape: bf16[128,128], index: 1, kind: input, shape index: {}]   ;;  %s618_s0 = inlined_call_operand.vmem [shape: bf16[128,128], index: 0, kind: input, shape index: {}]   ;;  %s619_s2 = inlined_call_operand.vmem [shape: f32[1,128], index: 2, kind: input, shape index: {}]   ;;  %s620_s3 = inlined_call_operand.vmem [shape: f32[128,128], index: 3, kind: output, shape index: {0}]   ;;  %s621_s4 = inlined_call_operand.vmem [shape: f32[1,1,128], index: 4, kind: output, shape index: {1}]   ;;  %s622_s5 = inlined_call_operand.vmem [shape: f32[1,1,128], index: 5, kind: output, shape index: {2}]  }
   0x1   :  { %v436_v0 = vld [vmem:[%s617_s1] sm:$0xff]   ;;  %v437_v1 = vld [vmem:[%s617_s1 + $0x8] sm:$0xff]   ;;  %v438_v2 = vld [vmem:[%s617_s1 + $0x10] sm:$0xff]  }
   0x2   :  { %388 = vmatprep.subr.bf16.mxu0 %v436_v0  ;;  %420 = vmatprep.subr.bf16.mxu1 %v436_v0  ;;  %v439_v3 = vld [vmem:[%s617_s1 + $0x18] sm:$0xff]   ;;  %v444_v4 = vld [vmem:[%s618_s0] sm:$0xff]   ;;  %v441_v7 = vld [vmem:[%s617_s1 + $0x28] sm:$0xff]  }
   0x3   :  { %389 = vmatpush3.bf16.msra.mxu0 %v436_v0  ;;  %428 = vmatpush3.bf16.msra.mxu1 %v436_v0  ;;  %v440_v5 = vld [vmem:[%s617_s1 + $0x20] sm:$0xff]   ;;  %v442_v8 = vld [vmem:[%s617_s1 + $0x30] sm:$0xff]   ;;  %v443_v9 = vld [vmem:[%s617_s1 + $0x38] sm:$0xff]  }
   0x4   :  { %390 = vmatprep.subr.bf16.mxu0 %v437_v1  ;;  %421 = vmatprep.subr.bf16.mxu1 %v437_v1  ;;  %v448_v6 = vld [vmem:[%s618_s0 + $0x20] sm:$0xff]   ;;  %v445_v10 = vld [vmem:[%s618_s0 + $0x8] sm:$0xff]   ;;  %v446_v12 = vld [vmem:[%s618_s0 + $0x10] sm:$0xff]  }
   0x5   :  { %404 = vmatprep.mubr.bf16.mxu0 %v444_v4  ;;  %412 = vmatprep.mubr.bf16.mxu1 %v448_v6  ;;  %v449_v11 = vld [vmem:[%s618_s0 + $0x28] sm:$0xff]   ;;  %v450_v13 = vld [vmem:[%s618_s0 + $0x30] sm:$0xff]   ;;  %v447_v14 = vld [vmem:[%s618_s0 + $0x18] sm:$0xff]  }
   0x6   :  { %v451_v15 = vld [vmem:[%s618_s0 + $0x38] sm:$0xff]   ;;  %v355_v16 = vld [vmem:[%s619_s2] ss:$0 sm:$0xff] }
   0x7   :  { %391 = vmatpush3.bf16.msra.mxu0 %v437_v1  ;;  %429 = vmatpush3.bf16.msra.mxu1 %v437_v1 }
   0x8   :  { %392 = vmatprep.subr.bf16.mxu0 %v438_v2  ;;  %422 = vmatprep.subr.bf16.mxu1 %v438_v2 }
   0xb   :  { %393 = vmatpush3.bf16.msra.mxu0 %v438_v2  ;;  %430 = vmatpush3.bf16.msra.mxu1 %v438_v2 }
   0xc   :  { %394 = vmatprep.subr.bf16.mxu0 %v439_v3  ;;  %423 = vmatprep.subr.bf16.mxu1 %v439_v3 }
   0xf   :  { %395 = vmatpush3.bf16.msra.mxu0 %v439_v3  ;;  %431 = vmatpush3.bf16.msra.mxu1 %v439_v3 }
  0x10   :  { %396 = vmatprep.subr.bf16.mxu0 %v440_v5  ;;  %424 = vmatprep.subr.bf16.mxu1 %v440_v5 }
  0x13   :  { %397 = vmatpush3.bf16.msra.mxu0 %v440_v5  ;;  %432 = vmatpush3.bf16.msra.mxu1 %v440_v5 }
  0x14   :  { %398 = vmatprep.subr.bf16.mxu0 %v441_v7  ;;  %425 = vmatprep.subr.bf16.mxu1 %v441_v7 }
  0x17   :  { %399 = vmatpush3.bf16.msra.mxu0 %v441_v7  ;;  %433 = vmatpush3.bf16.msra.mxu1 %v441_v7 }
  0x18   :  { %400 = vmatprep.subr.bf16.mxu0 %v442_v8  ;;  %426 = vmatprep.subr.bf16.mxu1 %v442_v8 }
  0x1b   :  { %401 = vmatpush3.bf16.msra.mxu0 %v442_v8  ;;  %434 = vmatpush3.bf16.msra.mxu1 %v442_v8 }
  0x1c   :  { %402 = vmatprep.subr.bf16.mxu0 %v443_v9  ;;  %427 = vmatprep.subr.bf16.mxu1 %v443_v9 }
  0x1f   :  { %403 = vmatpush3.bf16.msra.mxu0 %v443_v9  ;;  %435 = vmatpush3.bf16.msra.mxu1 %v443_v9 }
  0x22   :  { %405 = vmatmul.mubr.bf16.vlgmr.msra.gmra.mrb[0].mxu0 %v445_v10  ;;  %413 = vmatmul.mubr.bf16.vlgmr.msra.gmra.mrb[0].mxu1 %v449_v11 }
  0x23   :  { %408 = vmatprep.mubr.bf16.mxu0 %v446_v12  ;;  %416 = vmatprep.mubr.bf16.mxu1 %v450_v13 }
  0x2a   :  { %409 = vmatmul.mubr.bf16.gmra.mrb[4].mxu0 %v447_v14  ;;  %417 = vmatmul.mubr.bf16.gmra.mrb[4].mxu1 %v451_v15 }
  0xf5   :  { %v406_v17 = vpop.f32.mrb[0].mxu0  ;;  %v414_v18 = vpop.f32.mrb[0].mxu1 }
  0xf6   :  { %v533_v19 = vadd.f32 %v406_v17, %v355_v16  ;;  %v187_v20 = vpop.f32.mrb[1].mxu0  ;;  %v535_v21 = vadd.f32 %v414_v18, %v355_v16  ;;  %v219_v22 = vpop.f32.mrb[1].mxu1 }
  0xf7   :  { %v537_v23 = vadd.f32 %v355_v16, %v187_v20  ;;  %v407_v24 = vpop.f32.mrb[2].mxu0  ;;  %v539_v25 = vadd.f32 %v355_v16, %v219_v22  ;;  %v415_v26 = vpop.f32.mrb[2].mxu1 }
  0xf8   :  { %252 = vst [vmem:[%s620_s3 + $0x10] sm:$0xff] %v533_v19  ;;  %v545_v27 = vadd.f32 %v407_v24, %v355_v16  ;;  %v190_v28 = vpop.f32.mrb[3].mxu0  ;;  %260 = vst [vmem:[%s620_s3 + $0x50] sm:$0xff] %v535_v21  ;;  %v551_v29 = vadd.f32 %v415_v26, %v355_v16  ;;  %v222_v30 = vpop.f32.mrb[3].mxu1 }
  0xf9   :  { %250 = vst [vmem:[%s620_s3] sm:$0xff] %v537_v23  ;;  %v191_v31 = vadd.f32 %v355_v16, %v190_v28  ;;  %258 = vst [vmem:[%s620_s3 + $0x40] sm:$0xff] %v539_v25  ;;  %v223_v32 = vadd.f32 %v355_v16, %v222_v30 }
  0xfa   :  { %253 = vst [vmem:[%s620_s3 + $0x18] sm:$0xff] %v545_v27  ;;  %261 = vst [vmem:[%s620_s3 + $0x58] sm:$0xff] %v551_v29 }
  0xfb   :  { %251 = vst [vmem:[%s620_s3 + $0x8] sm:$0xff] %v191_v31  ;;  %v266_v33 = vadd.f32 %v191_v31, %v537_v23  ;;  %259 = vst [vmem:[%s620_s3 + $0x48] sm:$0xff] %v223_v32 }
  0xfd   :  { %v267_v34 = vadd.f32 %v266_v33, %v533_v19  ;;  %v410_v35 = vpop.f32.mrb[4].mxu0  ;;  %v418_v36 = vpop.f32.mrb[4].mxu1 }
  0xfe   :  { %v212_v37 = vadd.f32 %v410_v35, %v355_v16  ;;  %v203_v38 = vpop.f32.mrb[5].mxu0  ;;  %v244_v39 = vadd.f32 %v418_v36, %v355_v16  ;;  %v235_v40 = vpop.f32.mrb[5].mxu1 }
  0xff   :  { %v204_v41 = vadd.f32 %v355_v16, %v203_v38  ;;  %v268_v42 = vadd.f32 %v267_v34, %v545_v27  ;;  %v411_v43 = vpop.f32.mrb[6].mxu0  ;;  %v236_v44 = vadd.f32 %v355_v16, %v235_v40  ;;  %v419_v45 = vpop.f32.mrb[6].mxu1 }
 0x100   :  { %256 = vst [vmem:[%s620_s3 + $0x30] sm:$0xff] %v212_v37  ;;  %v215_v46 = vadd.f32 %v411_v43, %v355_v16  ;;  %v206_v47 = vpop.f32.mrb[7].mxu0  ;;  %264 = vst [vmem:[%s620_s3 + $0x70] sm:$0xff] %v244_v39  ;;  %v247_v48 = vadd.f32 %v419_v45, %v355_v16  ;;  %v238_v49 = vpop.f32.mrb[7].mxu1 }
 0x101   :  { %254 = vst [vmem:[%s620_s3 + $0x20] sm:$0xff] %v204_v41  ;;  %v269_v50 = vadd.f32 %v268_v42, %v204_v41  ;;  %v207_v51 = vadd.f32 %v355_v16, %v206_v47  ;;  %262 = vst [vmem:[%s620_s3 + $0x60] sm:$0xff] %v236_v44  ;;  %v239_v52 = vadd.f32 %v355_v16, %v238_v49 }
 0x102   :  { %257 = vst [vmem:[%s620_s3 + $0x38] sm:$0xff] %v215_v46  ;;  %265 = vst [vmem:[%s620_s3 + $0x78] sm:$0xff] %v247_v48 }
 0x103   :  { %255 = vst [vmem:[%s620_s3 + $0x28] sm:$0xff] %v207_v51  ;;  %v270_v53 = vadd.f32 %v269_v50, %v207_v51  ;;  %263 = vst [vmem:[%s620_s3 + $0x68] sm:$0xff] %v239_v52 }
 0x105   :  { %v271_v54 = vadd.f32 %v270_v53, %v212_v37 }
 0x107   :  { %v272_v55 = vadd.f32 %v271_v54, %v215_v46 }
 0x109   :  { %v273_v56 = vadd.f32 %v272_v55, %v539_v25 }
 0x10b   :  { %v274_v57 = vadd.f32 %v273_v56, %v223_v32 }
 0x10d   :  { %v275_v58 = vadd.f32 %v274_v57, %v535_v21 }
 0x10f   :  { %v276_v59 = vadd.f32 %v275_v58, %v551_v29 }
 0x111   :  { %v277_v60 = vadd.f32 %v276_v59, %v236_v44 }
 0x113   :  { %v278_v61 = vadd.f32 %v277_v60, %v239_v52 }
 0x115   :  { %v279_v62 = vadd.f32 %v278_v61, %v244_v39 }
 0x117   :  { %v280_v63 = vadd.f32 %v279_v62, %v247_v48 }
 0x119   :  { %v281_v0 = vrot.slane %v280_v63, 4 }
 0x11b   :  { %v282_v1 = vadd.f32 %v281_v0, %v280_v63 }
 0x11d   :  { %v283_v2 = vrot.slane %v282_v1, 2 }
 0x11f   :  { %v284_v3 = vadd.f32 %v283_v2, %v282_v1 }
 0x121   :  { %v285_v4 = vrot.slane %v284_v3, 1 }
 0x123   :  { %v286_v5 = vadd.f32 %v285_v4, %v284_v3 }
 0x125   :  { %v287_v6 = vmul.f32 0.0078125, %v286_v5 }
 0x127   :  { %v288_v7 = vsub.f32 %v537_v23, %v287_v6  ;;  %v289_v8 = vsub.f32 %v191_v31, %v287_v6  ;;  %v290_v9 = vsub.f32 %v533_v19, %v287_v6  ;;  %v291_v10 = vsub.f32 %v545_v27, %v287_v6  ;;  %341 = vst [vmem:[%s621_s4] sm:$0x1] %v287_v6 }
 0x128   :  { %v292_v11 = vsub.f32 %v204_v41, %v287_v6  ;;  %v293_v12 = vsub.f32 %v207_v51, %v287_v6  ;;  %v294_v13 = vsub.f32 %v212_v37, %v287_v6  ;;  %v295_v14 = vsub.f32 %v215_v46, %v287_v6 }
 0x129   :  { %v296_v15 = vsub.f32 %v539_v25, %v287_v6  ;;  %v297_v16 = vsub.f32 %v223_v32, %v287_v6  ;;  %v298_v17 = vsub.f32 %v535_v21, %v287_v6  ;;  %v299_v18 = vsub.f32 %v551_v29, %v287_v6 }
 0x12a   :  { %v300_v20 = vsub.f32 %v236_v44, %v287_v6  ;;  %v301_v22 = vsub.f32 %v239_v52, %v287_v6  ;;  %v302_v19 = vsub.f32 %v244_v39, %v287_v6  ;;  %v303_v23 = vsub.f32 %v247_v48, %v287_v6 }
 0x12b   :  { %v304_v24 = vmul.f32 %v288_v7, %v288_v7  ;;  %v305_v26 = vmul.f32 %v289_v8, %v289_v8  ;;  %v306_v27 = vmul.f32 %v290_v9, %v290_v9  ;;  %v307_v30 = vmul.f32 %v291_v10, %v291_v10 }
 0x12c   :  { %v308_v33 = vmul.f32 %v292_v11, %v292_v11  ;;  %v309_v35 = vmul.f32 %v293_v12, %v293_v12  ;;  %v310_v25 = vmul.f32 %v294_v13, %v294_v13  ;;  %v311_v37 = vmul.f32 %v295_v14, %v295_v14 }
 0x12d   :  { %v320_v28 = vadd.f32 %v305_v26, %v304_v24  ;;  %v312_v38 = vmul.f32 %v296_v15, %v296_v15  ;;  %v313_v40 = vmul.f32 %v297_v16, %v297_v16  ;;  %v314_v39 = vmul.f32 %v298_v17, %v298_v17 }
 0x12e   :  { %v315_v43 = vmul.f32 %v299_v18, %v299_v18  ;;  %v316_v45 = vmul.f32 %v300_v20, %v300_v20  ;;  %v317_v47 = vmul.f32 %v301_v22, %v301_v22  ;;  %v318_v49 = vmul.f32 %v302_v19, %v302_v19 }
 0x12f   :  { %v321_v31 = vadd.f32 %v320_v28, %v306_v27  ;;  %v319_v51 = vmul.f32 %v303_v23, %v303_v23 }
 0x131   :  { %v322_v34 = vadd.f32 %v321_v31, %v307_v30 }
 0x133   :  { %v323_v36 = vadd.f32 %v322_v34, %v308_v33 }
 0x135   :  { %v324_v32 = vadd.f32 %v323_v36, %v309_v35 }
 0x137   :  { %v325_v21 = vadd.f32 %v324_v32, %v310_v25 }
 0x139   :  { %v326_v29 = vadd.f32 %v325_v21, %v311_v37 }
 0x13b   :  { %v327_v41 = vadd.f32 %v326_v29, %v312_v38 }
 0x13d   :  { %v328_v42 = vadd.f32 %v327_v41, %v313_v40 }
 0x13f   :  { %v329_v44 = vadd.f32 %v328_v42, %v314_v39 }
 0x141   :  { %v330_v46 = vadd.f32 %v329_v44, %v315_v43 }
 0x143   :  { %v331_v48 = vadd.f32 %v330_v46, %v316_v45 }
 0x145   :  { %v332_v50 = vadd.f32 %v331_v48, %v317_v47 }
 0x147   :  { %v333_v52 = vadd.f32 %v332_v50, %v318_v49 }
 0x149   :  { %v334_v53 = vadd.f32 %v333_v52, %v319_v51 }
 0x14b   :  { %v335_v54 = vrot.slane %v334_v53, 4 }
 0x14d   :  { %v336_v55 = vadd.f32 %v335_v54, %v334_v53 }
 0x14f   :  { %v337_v56 = vrot.slane %v336_v55, 2 }
 0x151   :  { %v338_v57 = vadd.f32 %v337_v56, %v336_v55 }
 0x153   :  { %v339_v58 = vrot.slane %v338_v57, 1 }
 0x155   :  { %v340_v59 = vadd.f32 %v339_v58, %v338_v57 }
 0x157   :  { %342 = vst [vmem:[%s622_s5] sm:$0x1] %v340_v59 }

</bundles_post_ra>
